<compile_context>
chip_gen: v6e
topology: v6e:2x2x1
jax: 0.10.0
libtpu: 0.0.40
codegen_flags: <defaults>
</compile_context>

<pallas_src>
import jax
import jax.numpy as jnp
import numpy as np
from jax.experimental import pallas as pl
from jax.experimental.pallas import tpu as pltpu

# ----------------------------- config (small) -------------------------------
N = 16                      # graph nodes
D = 32                      # input_dim == hidden_dim (stand-in for 768)
HEADS = 8
CPH = D // HEADS            # out channels per head
NEG_SLOPE = 0.2             # GATConv default LeakyReLU slope
MASK_VAL = -1e9             # additive mask for non-edges (exp underflows to exactly 0)
RW = D + 2 * HEADS          # 48: fused per-layer RHS width  (xw | a_dst | a_src)
DH = D + HEADS              # 40: fused aggregation RHS width (agg | denom)
HN = HEADS * N              # 128: lane-stacked heads
assert (N & (N - 1)) == 0 and (CPH & (CPH - 1)) == 0
SHIFT_N = N.bit_length() - 1
SHIFT_C = CPH.bit_length() - 1
HP = jax.lax.Precision.HIGHEST


# ------------------------------- kernel -------------------------------------
def gat_encoder_kernel(feat_ref, wb_ref, out_ref):
    f32 = jnp.float32

    # -------- per-graph packed slab: x | anorm | additive adjacency mask --------
    feat = feat_ref[0]                              # [N, 2D] = [16, 64]
    x        = feat[:, 0:D]                         # [16, 32]
    anorm    = feat[:, D:D + N]                     # [16, 16]  D^-1/2 (A+I) D^-1/2
    adj_bias = feat[:, D + N:D + 2 * N]             # [16, 16]  0 on edge, -1e9 off

    # -------- shared packed weights / pre-broadcast biases (static ref slices) --------
    rhs1  = wb_ref[0:D, 0:RW]                       # [32, 48]  W1 | W1@att_dst1 | W1@att_src1
    rhs2  = wb_ref[0:D, RW:2 * RW]                  # [32, 48]
    wg    = wb_ref[0:D, 2 * RW:2 * RW + D]          # [32, 32]
    wmulv = wb_ref[0:D, 4 * D:8 * D]                # [32, 128] (wmu | wlv | 0)
    b1    = wb_ref[D:D + N, 0:D]                    # [16, 32]  broadcast biases
    b2    = wb_ref[D:D + N, D:2 * D]
    bg    = wb_ref[D:D + N, 2 * D:3 * D]
    bmulv = wb_ref[D:D + N, 4 * D:8 * D]            # [16, 128] (bmu | blv | 0)

    # -------- structural 0/1 matrices from iota compares (VPU work, no DMAs) --------
    def iota(shape, dim):
        return jax.lax.broadcasted_iota(jnp.int32, shape, dim)

    def mask01(cond):
        return jnp.where(cond, jnp.float32(1.0), jnp.float32(0.0))

    # rep[h, h*N + j] = 1
    rep = mask01((iota((HEADS, HN), 1) >> SHIFT_N) == iota((HEADS, HN), 0))        # [8, 128]
    # eye_m[j, h*N + j'] = (j == j')
    eye_m = mask01((iota((N, HN), 1) & (N - 1)) == iota((N, HN), 0))                # [16, 128]
    # rep_s[h*N + j, j'] = (j == j')
    rep_s = mask01((iota((HN, N), 0) & (N - 1)) == iota((HN, N), 1))                # [128, 16]
    # rep_c[h, h*C + c] = 1
    rep_c = mask01((iota((HEADS, D), 1) >> SHIFT_C) == iota((HEADS, D), 0))          # [8, 32]
    # aggregation RHS masks over [H*N, D+H]: block-diag for xw lanes, one-hot head for denom
    ra = iota((HN, DH), 0)
    ca = iota((HN, DH), 1)
    head_r = ra >> SHIFT_N
    mask_a = mask01((ca < D) & ((ca >> SHIFT_C) == head_r))                          # [128, 40]
    add_a  = mask01((ca >= D) & ((ca - D) == head_r))                                # [128, 40]
    ones_nn = jnp.ones((N, N), f32)

    # Additive adjacency mask tiled over heads with one MXU matmul: [N, H*N]
    adj_bias_big = jnp.dot(adj_bias, eye_m, preferred_element_type=f32)

    def gat_layer(h_in, rhs, bias):
        # One fused matmul: all-head features | per-head a_dst | per-head a_src.
        xwa = jnp.dot(h_in, rhs, preferred_element_type=f32)                 # [16, 48]
        a_dst = xwa[:, D:DH]                                                 # [16, 8]
        a_src = xwa[:, DH:RW]                                                # [16, 8]

        # e[i, h*N + j] = a_dst[i, h] + a_src[j, h]  (broadcasts built on the MXU)
        a_dst_b = jnp.dot(a_dst, rep, preferred_element_type=f32)            # [16, 128]
        a_src_d = jnp.dot(a_src, rep, preferred_element_type=f32) * eye_m    # diag-placed
        a_src_b = jnp.dot(ones_nn, a_src_d, preferred_element_type=f32)      # row broadcast
        e = a_dst_b + a_src_b

        # Leaky-ReLU + additive adjacency mask; no max shift needed (unmasked logits are
        # O(1), masked logits ~ -1e9 -> exp underflows to exactly 0).
        e = jnp.maximum(e, NEG_SLOPE * e) + adj_bias_big
        p = jnp.exp(e)                                                       # unnormalized attn

        # Block-diagonal head aggregation + per-head softmax denominator in ONE matmul.
        bd_plus = jnp.dot(rep_s, xwa[:, 0:DH], preferred_element_type=f32) * mask_a + add_a
        agg_plus = jnp.dot(p, bd_plus, preferred_element_type=f32)           # [16, 40]
        agg = agg_plus[:, 0:D]                                               # [16, 32]
        denom = jnp.dot(agg_plus[:, D:DH], rep_c, preferred_element_type=f32)  # [16, 32]
        return agg / denom + bias                                            # exact divide

    h = gat_layer(x, rhs1, b1)
    h = gat_layer(h, rhs2, b2)

    # GCN head: shared layer + relu, then fused (mu | logvar | pad) lane-dense store.
    xs = jnp.dot(h, wg, preferred_element_type=f32)
    xs = jnp.maximum(jnp.dot(anorm, xs, preferred_element_type=f32) + bg, 0.0)
    mulv = jnp.dot(xs, wmulv, preferred_element_type=f32)                    # [16, 128]
    out_ref[0] = jnp.dot(anorm, mulv, preferred_element_type=f32) + bmulv


# ------------------------------- wrapper -------------------------------------
def gat_encoder_forward(x_b, adj_b, anorm_b, params):
    """x_b: [B,N,D]; adj_b, anorm_b: [B,N,N] (per graph). Returns (mu, logvar) [B,N,D]."""
    (w1, as1, ad1, b1, w2, as2, ad2, b2, wg, bg, wmu, bmu, wlv, blv) = params
    B = x_b.shape[0]
    f32 = jnp.float32

    def att_block(a):   # [H, C] -> [H*C, H] with blk[h*C+c, h] = a[h, c]
        eye_h = jnp.eye(HEADS, dtype=f32)
        return (a[:, :, None] * eye_h[:, None, :]).reshape(D, HEADS)

    def fused_rhs(w, a_d, a_s):
        # [W | W@att_dst_blk | W@att_src_blk]: one in-kernel matmul yields xw, a_dst, a_src
        # (exact fusion since a_* are linear in xw).
        return jnp.concatenate(
            [w,
             jnp.dot(w, att_block(a_d), precision=HP),
             jnp.dot(w, att_block(a_s), precision=HP)], axis=1)              # [32, 48]

    rhs1 = fused_rhs(w1, ad1, as1)
    rhs2 = fused_rhs(w2, ad2, as2)
    wmulv = jnp.concatenate([wmu, wlv, jnp.zeros((D, 2 * D), f32)], axis=1)  # [32, 128]
    w_rows = jnp.concatenate([rhs1, rhs2, wg, wmulv], axis=1)                # [32, 256]

    b_rows = jnp.concatenate([
        jnp.broadcast_to(b1, (N, D)),
        jnp.broadcast_to(b2, (N, D)),
        jnp.broadcast_to(bg, (N, D)),
        jnp.zeros((N, D), f32),
        jnp.broadcast_to(jnp.concatenate([bmu, blv], axis=1), (N, 2 * D)),
        jnp.zeros((N, 2 * D), f32)], axis=1)                                 # [16, 256]
    wb = jnp.concatenate([w_rows, b_rows], axis=0).astype(f32)               # [48, 256]

    adj_bias = jnp.where(adj_b > 0, 0.0, MASK_VAL).astype(f32)               # [B, N, N]
    feat = jnp.concatenate([x_b.astype(f32), anorm_b.astype(f32), adj_bias], axis=2)  # [B,N,64]

    out = pl.pallas_call(
        gat_encoder_kernel,
        grid=(B,),
        in_specs=[pl.BlockSpec((1, N, 2 * D), lambda b: (b, 0, 0)),
                  pl.BlockSpec((D + N, 8 * D), lambda b: (0, 0))],
        out_specs=pl.BlockSpec((1, N, 4 * D), lambda b: (b, 0, 0)),
        out_shape=jax.ShapeDtypeStruct((B, N, 4 * D), f32),
        compiler_params=pltpu.CompilerParams(
            dimension_semantics=("parallel",),        # graphs shard across v7x's 2 TCs
            # TODO(synk): re-derive tiling/limit for the real 768-dim config (v7x: 64 MiB VMEM).
            vmem_limit_bytes=32 * 1024 * 1024),
        cost_estimate=pl.CostEstimate(
            flops=2_000_000 * B,
            transcendentals=4_096 * B,
            bytes_accessed=(N * 2 * D + (D + N) * 8 * D + N * 4 * D) * 4 * B),
    )(feat, wb)
    return out[:, :, 0:D], out[:, :, D:2 * D]


# --------------------------- pure-JAX reference ------------------------------
def _reference(x, adj, anorm, params):
    (w1, as1, ad1, b1, w2, as2, ad2, b2, wg, bg, wmu, bmu, wlv, blv) = params

    def gat(h, w, a_s, a_d, b):
        xw = jnp.dot(h, w, precision=HP)                       # [N, H*C]
        xwh = xw.reshape(N, HEADS, CPH)
        asrc = jnp.einsum('nhc,hc->nh', xwh, a_s, precision=HP)
        adst = jnp.einsum('nhc,hc->nh', xwh, a_d, precision=HP)
        e = adst[:, None, :] + asrc[None, :, :]                 # [i, j, h]
        e = jnp.where(e > 0, e, NEG_SLOPE * e)
        e = jnp.where(adj[:, :, None] > 0, e, -jnp.inf)
        p = jax.nn.softmax(e, axis=1)
        out = jnp.einsum('ijh,jhc->ihc', p, xwh, precision=HP).reshape(N, HEADS * CPH)
        return out + b

    def gcn(h, w, b):
        return jnp.dot(anorm, jnp.dot(h, w, precision=HP), precision=HP) + b

    h = gat(x, w1, as1, ad1, b1[0])
    h = gat(h, w2, as2, ad2, b2[0])
    xs = jax.nn.relu(gcn(h, wg, bg[0]))
    return gcn(xs, wmu, bmu[0]), gcn(xs, wlv, blv[0])


# --------------------------------- main ---------------------------------------
if __name__ == "__main__":
    key = jax.random.PRNGKey(0)
    ks = jax.random.split(key, 16)

    B = 2
    x_b = jax.random.normal(ks[0], (B, N, D), dtype=jnp.float32)

    def build_graph(extra_edges):
        # bidirectional ring (+ optional chords), self loops, GCN symmetric normalization.
        src = np.concatenate([np.arange(N), (np.arange(N) + 1) % N])
        dst = np.concatenate([(np.arange(N) + 1) % N, np.arange(N)])
        A = np.zeros((N, N), np.float32)
        A[dst, src] = 1.0                                       # A[target, source]
        for s, d in extra_edges:
            A[d, s] = 1.0
            A[s, d] = 1.0
        adj = np.minimum(A + np.eye(N, dtype=np.float32), 1.0)  # with self loops
        deg = adj.sum(axis=1)
        dinv = 1.0 / np.sqrt(deg)
        anorm = (dinv[:, None] * adj * dinv[None, :]).astype(np.float32)
        return adj, anorm

    adj0, an0 = build_graph([])
    adj1, an1 = build_graph([(0, 5), (3, 11), (7, 12)])
    adj_b = jnp.asarray(np.stack([adj0, adj1]))
    anorm_b = jnp.asarray(np.stack([an0, an1]))

    def init(k, shape, scale=0.2):
        return (scale * jax.random.normal(k, shape)).astype(jnp.float32)

    params = [
        init(ks[1], (D, HEADS * CPH)),   # GAT1 weight
        init(ks[2], (HEADS, CPH)),       # GAT1 att_src
        init(ks[3], (HEADS, CPH)),       # GAT1 att_dst
        init(ks[4], (1, HEADS * CPH)),   # GAT1 bias
        init(ks[5], (D, HEADS * CPH)),   # GAT2 weight
        init(ks[6], (HEADS, CPH)),       # GAT2 att_src
        init(ks[7], (HEADS, CPH)),       # GAT2 att_dst
        init(ks[8], (1, HEADS * CPH)),   # GAT2 bias
        init(ks[9], (D, D)),             # gcn_shared weight
        init(ks[10], (1, D)),            # gcn_shared bias
        init(ks[11], (D, D)),            # gcn_mu weight
        init(ks[12], (1, D)),            # gcn_mu bias
        init(ks[13], (D, D)),            # gcn_logvar weight
        init(ks[14], (1, D)),            # gcn_logvar bias
    ]

    mu, logvar = gat_encoder_forward(x_b, adj_b, anorm_b, params)
    mu = jax.block_until_ready(mu)
    logvar = jax.block_until_ready(logvar)

    # Tolerance: reference runs at precision=HIGHEST (true f32); the kernel's MXU matmuls
    # may run as bf16 passes on hardware, so allow a few e-3 of accumulated drift.
    for b in range(B):
        mu_ref, lv_ref = _reference(x_b[b], adj_b[b], anorm_b[b], params)
        assert np.allclose(np.asarray(mu[b]), np.asarray(mu_ref), atol=3e-2, rtol=3e-2)
        assert np.allclose(np.asarray(logvar[b]), np.asarray(lv_ref), atol=3e-2, rtol=3e-2)

    print("KERNEL_OK")
</pallas_src>

<mosaic_0001>
module attributes {stable_mosaic.version = 11 : i64} {
  func.func @gat_encoder_kernel(%arg0: i32, %arg1: memref<1x16x64xf32, #tpu.memory_space<vmem>>, %arg2: memref<48x256xf32, #tpu.memory_space<vmem>>, %arg3: memref<1x16x128xf32, #tpu.memory_space<vmem>>) attributes {dimension_semantics = [#tpu.dimension_semantics<parallel>], iteration_bounds = array<i64: 2>, scalar_prefetch = 0 : i64, scratch_operands = 0 : i64, tpu.core_type = #tpu.core_type<tc>, window_params = [{transform_indices = @transform_0, window_bounds = array<i64: 1, 16, 64>}, {pipeline_mode = #tpu.pipeline_mode<synchronous>, transform_indices = @transform_1, window_bounds = array<i64: 48, 256>}, {transform_indices = @transform_2, window_bounds = array<i64: 1, 16, 128>}]} {
    %c0 = arith.constant 0 : index
    %c0_0 = arith.constant 0 : index
    %c0_1 = arith.constant 0 : index
    %0 = vector.load %arg1[%c0, %c0_0, %c0_1] : memref<1x16x64xf32, #tpu.memory_space<vmem>>, vector<1x16x64xf32>
    %1 = vector.shape_cast %0 : vector<1x16x64xf32> to vector<16x64xf32>
    %2 = vector.extract_strided_slice %1 {offsets = [0, 0], sizes = [16, 32], strides = [1, 1]} : vector<16x64xf32> to vector<16x32xf32>
    %3 = vector.extract_strided_slice %1 {offsets = [0, 32], sizes = [16, 16], strides = [1, 1]} : vector<16x64xf32> to vector<16x16xf32>
    %4 = vector.extract_strided_slice %1 {offsets = [0, 48], sizes = [16, 16], strides = [1, 1]} : vector<16x64xf32> to vector<16x16xf32>
    %c0_2 = arith.constant 0 : index
    %c0_3 = arith.constant 0 : index
    %5 = vector.load %arg2[%c0_2, %c0_3] : memref<48x256xf32, #tpu.memory_space<vmem>>, vector<32x48xf32>
    %c0_4 = arith.constant 0 : index
    %c48 = arith.constant 48 : index
    %6 = vector.load %arg2[%c0_4, %c48] : memref<48x256xf32, #tpu.memory_space<vmem>>, vector<32x48xf32>
    %c0_5 = arith.constant 0 : index
    %c96 = arith.constant 96 : index
    %7 = vector.load %arg2[%c0_5, %c96] : memref<48x256xf32, #tpu.memory_space<vmem>>, vector<32x32xf32>
    %c0_6 = arith.constant 0 : index
    %c128 = arith.constant 128 : index
    %8 = vector.load %arg2[%c0_6, %c128] : memref<48x256xf32, #tpu.memory_space<vmem>>, vector<32x128xf32>
    %c32 = arith.constant 32 : index
    %c0_7 = arith.constant 0 : index
    %9 = vector.load %arg2[%c32, %c0_7] : memref<48x256xf32, #tpu.memory_space<vmem>>, vector<16x32xf32>
    %c32_8 = arith.constant 32 : index
    %c32_9 = arith.constant 32 : index
    %10 = vector.load %arg2[%c32_8, %c32_9] : memref<48x256xf32, #tpu.memory_space<vmem>>, vector<16x32xf32>
    %c32_10 = arith.constant 32 : index
    %c64 = arith.constant 64 : index
    %11 = vector.load %arg2[%c32_10, %c64] : memref<48x256xf32, #tpu.memory_space<vmem>>, vector<16x32xf32>
    %c32_11 = arith.constant 32 : index
    %c128_12 = arith.constant 128 : index
    %12 = vector.load %arg2[%c32_11, %c128_12] : memref<48x256xf32, #tpu.memory_space<vmem>>, vector<16x128xf32>
    %13 = tpu.iota {dimensions = array<i32: 1>} : vector<8x128xi32>
    %c4_i32 = arith.constant 4 : i32
    %14 = vector.broadcast %c4_i32 : i32 to vector<8x128xi32>
    %15 = arith.shrsi %13, %14 : vector<8x128xi32>
    %16 = tpu.iota {dimensions = array<i32: 0>} : vector<8x128xi32>
    %17 = arith.cmpi eq, %15, %16 : vector<8x128xi32>
    %cst = arith.constant 1.000000e+00 : f32
    %cst_13 = arith.constant 0.000000e+00 : f32
    %18 = vector.broadcast %cst : f32 to vector<8x128xf32>
    %19 = vector.broadcast %cst_13 : f32 to vector<8x128xf32>
    %20 = arith.select %17, %18, %19 : vector<8x128xi1>, vector<8x128xf32>
    %21 = tpu.iota {dimensions = array<i32: 1>} : vector<16x128xi32>
    %c15_i32 = arith.constant 15 : i32
    %22 = vector.broadcast %c15_i32 : i32 to vector<16x128xi32>
    %23 = arith.andi %21, %22 : vector<16x128xi32>
    %24 = tpu.iota {dimensions = array<i32: 0>} : vector<16x128xi32>
    %25 = arith.cmpi eq, %23, %24 : vector<16x128xi32>
    %cst_14 = arith.constant 1.000000e+00 : f32
    %cst_15 = arith.constant 0.000000e+00 : f32
    %26 = vector.broadcast %cst_14 : f32 to vector<16x128xf32>
    %27 = vector.broadcast %cst_15 : f32 to vector<16x128xf32>
    %28 = arith.select %25, %26, %27 : vector<16x128xi1>, vector<16x128xf32>
    %29 = tpu.iota {dimensions = array<i32: 0>} : vector<128x16xi32>
    %c15_i32_16 = arith.constant 15 : i32
    %30 = vector.broadcast %c15_i32_16 : i32 to vector<128x16xi32>
    %31 = arith.andi %29, %30 : vector<128x16xi32>
    %32 = tpu.iota {dimensions = array<i32: 1>} : vector<128x16xi32>
    %33 = arith.cmpi eq, %31, %32 : vector<128x16xi32>
    %cst_17 = arith.constant 1.000000e+00 : f32
    %cst_18 = arith.constant 0.000000e+00 : f32
    %34 = vector.broadcast %cst_17 : f32 to vector<128x16xf32>
    %35 = vector.broadcast %cst_18 : f32 to vector<128x16xf32>
    %36 = arith.select %33, %34, %35 : vector<128x16xi1>, vector<128x16xf32>
    %37 = tpu.iota {dimensions = array<i32: 1>} : vector<8x32xi32>
    %c2_i32 = arith.constant 2 : i32
    %38 = vector.broadcast %c2_i32 : i32 to vector<8x32xi32>
    %39 = arith.shrsi %37, %38 : vector<8x32xi32>
    %40 = tpu.iota {dimensions = array<i32: 0>} : vector<8x32xi32>
    %41 = arith.cmpi eq, %39, %40 : vector<8x32xi32>
    %cst_19 = arith.constant 1.000000e+00 : f32
    %cst_20 = arith.constant 0.000000e+00 : f32
    %42 = vector.broadcast %cst_19 : f32 to vector<8x32xf32>
    %43 = vector.broadcast %cst_20 : f32 to vector<8x32xf32>
    %44 = arith.select %41, %42, %43 : vector<8x32xi1>, vector<8x32xf32>
    %45 = tpu.iota {dimensions = array<i32: 0>} : vector<128x40xi32>
    %46 = tpu.iota {dimensions = array<i32: 1>} : vector<128x40xi32>
    %c4_i32_21 = arith.constant 4 : i32
    %47 = vector.broadcast %c4_i32_21 : i32 to vector<128x40xi32>
    %48 = arith.shrsi %45, %47 : vector<128x40xi32>
    %c32_i32 = arith.constant 32 : i32
    %49 = vector.broadcast %c32_i32 : i32 to vector<128x40xi32>
    %50 = arith.cmpi slt, %46, %49 : vector<128x40xi32>
    %c2_i32_22 = arith.constant 2 : i32
    %51 = vector.broadcast %c2_i32_22 : i32 to vector<128x40xi32>
    %52 = arith.shrsi %46, %51 : vector<128x40xi32>
    %53 = arith.cmpi eq, %52, %48 : vector<128x40xi32>
    %54 = arith.andi %50, %53 : vector<128x40xi1>
    %cst_23 = arith.constant 1.000000e+00 : f32
    %cst_24 = arith.constant 0.000000e+00 : f32
    %55 = vector.broadcast %cst_23 : f32 to vector<128x40xf32>
    %56 = vector.broadcast %cst_24 : f32 to vector<128x40xf32>
    %57 = arith.select %54, %55, %56 : vector<128x40xi1>, vector<128x40xf32>
    %c32_i32_25 = arith.constant 32 : i32
    %58 = vector.broadcast %c32_i32_25 : i32 to vector<128x40xi32>
    %59 = arith.cmpi sge, %46, %58 : vector<128x40xi32>
    %c32_i32_26 = arith.constant 32 : i32
    %60 = vector.broadcast %c32_i32_26 : i32 to vector<128x40xi32>
    %61 = arith.subi %46, %60 : vector<128x40xi32>
    %62 = arith.cmpi eq, %61, %48 : vector<128x40xi32>
    %63 = arith.andi %59, %62 : vector<128x40xi1>
    %cst_27 = arith.constant 1.000000e+00 : f32
    %cst_28 = arith.constant 0.000000e+00 : f32
    %64 = vector.broadcast %cst_27 : f32 to vector<128x40xf32>
    %65 = vector.broadcast %cst_28 : f32 to vector<128x40xf32>
    %66 = arith.select %63, %64, %65 : vector<128x40xi1>, vector<128x40xf32>
    %cst_29 = arith.constant 1.000000e+00 : f32
    %67 = vector.broadcast %cst_29 : f32 to vector<16x16xf32>
    %cst_30 = arith.constant dense<0.000000e+00> : vector<16x128xf32>
    %68 = tpu.matmul %4, %28, %cst_30 {dimension_numbers = #tpu.dot_dimension_numbers<[1], [0], [0], [1], [0, 0, 1, 1], [], []>} : vector<16x16xf32>, vector<16x128xf32>, vector<16x128xf32> -> vector<16x128xf32>
    %cst_31 = arith.constant dense<0.000000e+00> : vector<16x48xf32>
    %69 = tpu.matmul %2, %5, %cst_31 {dimension_numbers = #tpu.dot_dimension_numbers<[1], [0], [0], [1], [0, 0, 1, 1], [], []>} : vector<16x32xf32>, vector<32x48xf32>, vector<16x48xf32> -> vector<16x48xf32>
    %70 = vector.extract_strided_slice %69 {offsets = [0, 32], sizes = [16, 8], strides = [1, 1]} : vector<16x48xf32> to vector<16x8xf32>
    %71 = vector.extract_strided_slice %69 {offsets = [0, 40], sizes = [16, 8], strides = [1, 1]} : vector<16x48xf32> to vector<16x8xf32>
    %cst_32 = arith.constant dense<0.000000e+00> : vector<16x128xf32>
    %72 = tpu.matmul %70, %20, %cst_32 {dimension_numbers = #tpu.dot_dimension_numbers<[1], [0], [0], [1], [0, 0, 1, 1], [], []>} : vector<16x8xf32>, vector<8x128xf32>, vector<16x128xf32> -> vector<16x128xf32>
    %cst_33 = arith.constant dense<0.000000e+00> : vector<16x128xf32>
    %73 = tpu.matmul %71, %20, %cst_33 {dimension_numbers = #tpu.dot_dimension_numbers<[1], [0], [0], [1], [0, 0, 1, 1], [], []>} : vector<16x8xf32>, vector<8x128xf32>, vector<16x128xf32> -> vector<16x128xf32>
    %74 = arith.mulf %73, %28 : vector<16x128xf32>
    %cst_34 = arith.constant dense<0.000000e+00> : vector<16x128xf32>
    %75 = tpu.matmul %67, %74, %cst_34 {dimension_numbers = #tpu.dot_dimension_numbers<[1], [0], [0], [1], [0, 0, 1, 1], [], []>} : vector<16x16xf32>, vector<16x128xf32>, vector<16x128xf32> -> vector<16x128xf32>
    %76 = arith.addf %72, %75 : vector<16x128xf32>
    %cst_35 = arith.constant 2.000000e-01 : f32
    %77 = vector.broadcast %cst_35 : f32 to vector<16x128xf32>
    %78 = arith.mulf %77, %76 : vector<16x128xf32>
    %79 = arith.maximumf %76, %78 : vector<16x128xf32>
    %80 = arith.addf %79, %68 : vector<16x128xf32>
    %81 = math.exp %80 : vector<16x128xf32>
    %82 = vector.extract_strided_slice %69 {offsets = [0, 0], sizes = [16, 40], strides = [1, 1]} : vector<16x48xf32> to vector<16x40xf32>
    %cst_36 = arith.constant dense<0.000000e+00> : vector<128x40xf32>
    %83 = tpu.matmul %36, %82, %cst_36 {dimension_numbers = #tpu.dot_dimension_numbers<[1], [0], [0], [1], [0, 0, 1, 1], [], []>} : vector<128x16xf32>, vector<16x40xf32>, vector<128x40xf32> -> vector<128x40xf32>
    %84 = arith.mulf %83, %57 : vector<128x40xf32>
    %85 = arith.addf %84, %66 : vector<128x40xf32>
    %cst_37 = arith.constant dense<0.000000e+00> : vector<16x40xf32>
    %86 = tpu.matmul %81, %85, %cst_37 {dimension_numbers = #tpu.dot_dimension_numbers<[1], [0], [0], [1], [0, 0, 1, 1], [], []>} : vector<16x128xf32>, vector<128x40xf32>, vector<16x40xf32> -> vector<16x40xf32>
    %87 = vector.extract_strided_slice %86 {offsets = [0, 0], sizes = [16, 32], strides = [1, 1]} : vector<16x40xf32> to vector<16x32xf32>
    %88 = vector.extract_strided_slice %86 {offsets = [0, 32], sizes = [16, 8], strides = [1, 1]} : vector<16x40xf32> to vector<16x8xf32>
    %cst_38 = arith.constant dense<0.000000e+00> : vector<16x32xf32>
    %89 = tpu.matmul %88, %44, %cst_38 {dimension_numbers = #tpu.dot_dimension_numbers<[1], [0], [0], [1], [0, 0, 1, 1], [], []>} : vector<16x8xf32>, vector<8x32xf32>, vector<16x32xf32> -> vector<16x32xf32>
    %90 = arith.divf %87, %89 : vector<16x32xf32>
    %91 = arith.addf %90, %9 : vector<16x32xf32>
    %cst_39 = arith.constant dense<0.000000e+00> : vector<16x48xf32>
    %92 = tpu.matmul %91, %6, %cst_39 {dimension_numbers = #tpu.dot_dimension_numbers<[1], [0], [0], [1], [0, 0, 1, 1], [], []>} : vector<16x32xf32>, vector<32x48xf32>, vector<16x48xf32> -> vector<16x48xf32>
    %93 = vector.extract_strided_slice %92 {offsets = [0, 32], sizes = [16, 8], strides = [1, 1]} : vector<16x48xf32> to vector<16x8xf32>
    %94 = vector.extract_strided_slice %92 {offsets = [0, 40], sizes = [16, 8], strides = [1, 1]} : vector<16x48xf32> to vector<16x8xf32>
    %cst_40 = arith.constant dense<0.000000e+00> : vector<16x128xf32>
    %95 = tpu.matmul %93, %20, %cst_40 {dimension_numbers = #tpu.dot_dimension_numbers<[1], [0], [0], [1], [0, 0, 1, 1], [], []>} : vector<16x8xf32>, vector<8x128xf32>, vector<16x128xf32> -> vector<16x128xf32>
    %cst_41 = arith.constant dense<0.000000e+00> : vector<16x128xf32>
    %96 = tpu.matmul %94, %20, %cst_41 {dimension_numbers = #tpu.dot_dimension_numbers<[1], [0], [0], [1], [0, 0, 1, 1], [], []>} : vector<16x8xf32>, vector<8x128xf32>, vector<16x128xf32> -> vector<16x128xf32>
    %97 = arith.mulf %96, %28 : vector<16x128xf32>
    %cst_42 = arith.constant dense<0.000000e+00> : vector<16x128xf32>
    %98 = tpu.matmul %67, %97, %cst_42 {dimension_numbers = #tpu.dot_dimension_numbers<[1], [0], [0], [1], [0, 0, 1, 1], [], []>} : vector<16x16xf32>, vector<16x128xf32>, vector<16x128xf32> -> vector<16x128xf32>
    %99 = arith.addf %95, %98 : vector<16x128xf32>
    %cst_43 = arith.constant 2.000000e-01 : f32
    %100 = vector.broadcast %cst_43 : f32 to vector<16x128xf32>
    %101 = arith.mulf %100, %99 : vector<16x128xf32>
    %102 = arith.maximumf %99, %101 : vector<16x128xf32>
    %103 = arith.addf %102, %68 : vector<16x128xf32>
    %104 = math.exp %103 : vector<16x128xf32>
    %105 = vector.extract_strided_slice %92 {offsets = [0, 0], sizes = [16, 40], strides = [1, 1]} : vector<16x48xf32> to vector<16x40xf32>
    %cst_44 = arith.constant dense<0.000000e+00> : vector<128x40xf32>
    %106 = tpu.matmul %36, %105, %cst_44 {dimension_numbers = #tpu.dot_dimension_numbers<[1], [0], [0], [1], [0, 0, 1, 1], [], []>} : vector<128x16xf32>, vector<16x40xf32>, vector<128x40xf32> -> vector<128x40xf32>
    %107 = arith.mulf %106, %57 : vector<128x40xf32>
    %108 = arith.addf %107, %66 : vector<128x40xf32>
    %cst_45 = arith.constant dense<0.000000e+00> : vector<16x40xf32>
    %109 = tpu.matmul %104, %108, %cst_45 {dimension_numbers = #tpu.dot_dimension_numbers<[1], [0], [0], [1], [0, 0, 1, 1], [], []>} : vector<16x128xf32>, vector<128x40xf32>, vector<16x40xf32> -> vector<16x40xf32>
    %110 = vector.extract_strided_slice %109 {offsets = [0, 0], sizes = [16, 32], strides = [1, 1]} : vector<16x40xf32> to vector<16x32xf32>
    %111 = vector.extract_strided_slice %109 {offsets = [0, 32], sizes = [16, 8], strides = [1, 1]} : vector<16x40xf32> to vector<16x8xf32>
    %cst_46 = arith.constant dense<0.000000e+00> : vector<16x32xf32>
    %112 = tpu.matmul %111, %44, %cst_46 {dimension_numbers = #tpu.dot_dimension_numbers<[1], [0], [0], [1], [0, 0, 1, 1], [], []>} : vector<16x8xf32>, vector<8x32xf32>, vector<16x32xf32> -> vector<16x32xf32>
    %113 = arith.divf %110, %112 : vector<16x32xf32>
    %114 = arith.addf %113, %10 : vector<16x32xf32>
    %cst_47 = arith.constant dense<0.000000e+00> : vector<16x32xf32>
    %115 = tpu.matmul %114, %7, %cst_47 {dimension_numbers = #tpu.dot_dimension_numbers<[1], [0], [0], [1], [0, 0, 1, 1], [], []>} : vector<16x32xf32>, vector<32x32xf32>, vector<16x32xf32> -> vector<16x32xf32>
    %cst_48 = arith.constant dense<0.000000e+00> : vector<16x32xf32>
    %116 = tpu.matmul %3, %115, %cst_48 {dimension_numbers = #tpu.dot_dimension_numbers<[1], [0], [0], [1], [0, 0, 1, 1], [], []>} : vector<16x16xf32>, vector<16x32xf32>, vector<16x32xf32> -> vector<16x32xf32>
    %117 = arith.addf %116, %11 : vector<16x32xf32>
    %cst_49 = arith.constant 0.000000e+00 : f32
    %118 = vector.broadcast %cst_49 : f32 to vector<16x32xf32>
    %119 = arith.maximumf %117, %118 : vector<16x32xf32>
    %cst_50 = arith.constant dense<0.000000e+00> : vector<16x128xf32>
    %120 = tpu.matmul %119, %8, %cst_50 {dimension_numbers = #tpu.dot_dimension_numbers<[1], [0], [0], [1], [0, 0, 1, 1], [], []>} : vector<16x32xf32>, vector<32x128xf32>, vector<16x128xf32> -> vector<16x128xf32>
    %cst_51 = arith.constant dense<0.000000e+00> : vector<16x128xf32>
    %121 = tpu.matmul %3, %120, %cst_51 {dimension_numbers = #tpu.dot_dimension_numbers<[1], [0], [0], [1], [0, 0, 1, 1], [], []>} : vector<16x16xf32>, vector<16x128xf32>, vector<16x128xf32> -> vector<16x128xf32>
    %122 = arith.addf %121, %12 : vector<16x128xf32>
    %c0_52 = arith.constant 0 : index
    %c0_53 = arith.constant 0 : index
    %c0_54 = arith.constant 0 : index
    %123 = vector.load %arg3[%c0_52, %c0_53, %c0_54] : memref<1x16x128xf32, #tpu.memory_space<vmem>>, vector<1x16x128xf32>
    %124 = vector.shape_cast %123 : vector<1x16x128xf32> to vector<16x128xf32>
    %125 = vector.shape_cast %122 : vector<16x128xf32> to vector<1x16x128xf32>
    tpu.vector_store %arg3[%c0_52, %c0_53, %c0_54], %125 {strides = array<i32>} : memref<1x16x128xf32, #tpu.memory_space<vmem>>, vector<1x16x128xf32>,
    return
  }
  func.func @transform_0(%arg0: i32) -> (i32, i32, i32) {
    %c0_i32 = arith.constant 0 : i32
    %c0_i32_0 = arith.constant 0 : i32
    %c0_i32_1 = arith.constant 0 : i32
    return %arg0, %c0_i32, %c0_i32_0 : i32, i32, i32
  }
  func.func @transform_1(%arg0: i32) -> (i32, i32) {
    %c0_i32 = arith.constant 0 : i32
    %c0_i32_0 = arith.constant 0 : i32
    %c0_i32_1 = arith.constant 0 : i32
    return %c0_i32, %c0_i32_0 : i32, i32
  }
  func.func @transform_2(%arg0: i32) -> (i32, i32, i32) {
    %c0_i32 = arith.constant 0 : i32
    %c0_i32_0 = arith.constant 0 : i32
    %c0_i32_1 = arith.constant 0 : i32
    return %arg0, %c0_i32, %c0_i32_0 : i32, i32, i32
  }
}

</mosaic_0001>

<bundles_post_ra>
// kernel: tpu_custom_call.1
= control target key start
LH: loop header
LB: loop body
LE: loop exit
PB: predicated region body
PF: predicated region fallthrough
CT: control target
= control target key end

     0   :  { %7 = vsyncpa [#allocation3], 0  ;;  %s4216_s0 = inlined_call_operand.hbm [shape: f32[2,16,64], index: 0, kind: input, shape index: {}]   ;;  %s4217_s1 = inlined_call_operand.hbm [shape: f32[48,256], index: 1, kind: input, shape index: {}]   ;;  %s4218_s2 = inlined_call_operand.hbm [shape: f32[2,16,128], index: 2, kind: output, shape index: {}]  }
   0x1   :  { %9 = vsyncpa [#allocation3 + $0x1], 0 }
   0x2   :  { %10 = vsyncpa [#allocation6], 0 }
   0x3   :  { %11 = vsyncpa [#allocation4], 0 }
   0x4   :  { %13 = vsyncpa [#allocation4 + $0x1], 0  ;;  %s3047_s9 = smov 0   ;;  %s3049_s10 = smov 0  }
   0x5   :  { %s3051_s11 = smov 0   ;;  %s3053_s12 = smov 0  }
   0x6 LB: > { %s3068_s13 = sadd.s32 4294967295, %s3014_s12   ;;  %s2342_s14 = sadd.s32 4294967294, %s3014_s12   ;;  %s3014_s12 = sphi %s3053_s12, %s4406_s12   ;;  %s3010_s11 = sphi %s3051_s11, %s4405_s11   ;;  %s3006_s10 = sphi %s3049_s10, %s4404_s10   ;;  %s3002_s9 = sphi %s3047_s9, %s4403_s9  }
   0x7   : > { %p39_p0 = scmp.ne.s32.totalorder %s3006_s10, %s3002_s9  ;;  %p4219_p1 = scmp.eq.s32.totalorder %s3068_s13, 0 }
   0x8   : > { %p90_p3 = scmp.eq.s32.totalorder %s2342_s14, 1  ;;  %p2343_p5 = scmp.ge.s32.totalorder %s3014_s12, 1 }
   0x9   : > { %p3077_p4 = por %p4219_p1, %p39_p0  ;;  %p97_p7 = scmp.lt.s32.totalorder %s3014_s12, 3 }
   0xa   : > { %p3082_p6 = por %p90_p3, %p39_p0  ;;  %s3016_s18 = smov [#allocation5]  }
   0xb   : > { %s4241_s15 = scalar_select %p3077_p4, 1, 0 }
   0xc   : > { %s4242_s16 = scalar_select %p3082_p6, 1, 0 }
   0xd   : > { %p3087_p8 = pnand %p2343_p5, %p97_p7  ;;  %s109_s19 = sshll.u32 %s3016_s18, 4  ;;  %s110_s19 = int_to_ptr.vmem [resolvable:$true] %s109_s19 }
   0xe   : > { %s3101_s21 = sadd.s32 1, %s3014_s12   ;;  %s26_s22 = sadd.s32 1, %s3010_s11 }
   0xf   : > { %s4243_s17 = scalar_select %p3087_p8, 1, 0 }
  0x10   : > { %p2808_p9 = pneg %p3087_p8  ;;  %s23_s23 = ssub.s32 %s3014_s12, %s3101_s21 }
  0x11   : > { %s2903_s24 = scalar_lea.vmem %s110_s19, 1536  ;;  %p2911_p5 = scmp.lt.s32.totalorder %s110_s19, %s110_s19 }
  0x12   : > { %p3096_p11 = pnand %p2808_p9, %p4219_p1  ;;  %p2904_p13 = scmp.ne.s32.totalorder %s110_s19, %s2903_s24 }
  0x13   : > { %p2912_p7 = scmp.lt.s32.totalorder %s2903_s24, %s2903_s24 }
  0x14   : > { %p2894_p12 = pneg %p3096_p11 }
  0x15   : > { %p2913_p10 = por %p2912_p7, %p2911_p5 }
  0x16   : > { %p2906_p0 = pnand %p2904_p13, %p2894_p12 }
  0x18   : > { %p2907_p3 = pneg %p2906_p0 }
  0x1a   : > { %p2914_p2 = pnand %p2913_p10, %p2907_p3 }
  0x1c   : > { %2917 = shalt.err (!%p2914_p2)
}
  0x1d   : > { %s3017_s25 = smov 256   ;;  %s3018_s26 = smov 16  }
  0x1e   : > { %2811 = dma.hbm_to_vmem [thread:$0]  (!%p3096_p11), %s4217_s1, 1536, %s110_s19, [#allocation6], %s3017_s25, %s3017_s25, %s3018_s26  }
  0x1f   : > { %p24_p9 = scmp.eq.s32.totalorder %s23_s23, 0  ;;  %p33_p12 = scmp.ne.s32.totalorder %s3010_s11, %s3006_s10 }
  0x20   : > { %p34_p10 = scmp.eq.s32.totalorder %s3014_s12, 0  ;;  %p2821_p2 = scmp.lt.s32.totalorder %s3014_s12, 2 }
  0x21   : > { %s3118_s29 = scalar_select %p24_p9, %s3010_s11, %s26_s22  }
  0x22   : > { %p35_p13 = por %p34_p10, %p33_p12  ;;  %p4245_p0 = scmp.eq.s32.totalorder %s3068_s13, 1 }
  0x23   : > { %s123_s3 = sand.u32 1, %s3010_s11   ;;  %s2429_s4 = sshll.u32 %s3014_s12, 8 }
  0x24   : > { %p3122_p3 = por %p4245_p0, %p33_p12  ;;  %s2346_s5 = sshll.u32 %s123_s3, 4 }
  0x25   : > { %s3131_s8 = scalar_lea.hbm %s4216_s0, %s2429_s4  ;;  %s127_s14 = scalar_lea.vmem [#allocation2], %s2346_s5 }
  0x26   : > { %s4246_s30 = scalar_select %p3122_p3, 1, 0 }
  0x27   : > { %s134_s18 = sshll.u32 %s127_s14, 4  ;;  %p3133_p11 = pnand %p2821_p2, %p35_p13  ;;  %s3137_s18 = int_to_ptr.vmem [resolvable:$true] %s134_s18 }
  0x28   : > { %s3139_s20 = scalar_lea.sflag [#allocation3], %s123_s3  ;;  %s2918_s22 = scalar_lea.hbm %s3131_s8, 256 }
  0x29   : > { %p2919_p5 = scmp.ne.s32.totalorder %s3131_s8, %s2918_s22  ;;  %p2920_p7 = pneg %p3133_p11 }
  0x2a   : > { %s2923_s25 = scalar_lea.hbm %s4216_s0, 512  ;;  %p2924_p10 = scmp.lt.s32.totalorder %s3131_s8, %s4216_s0 }
  0x2b   : > { %p2921_p9 = pnand %p2920_p7, %p2919_p5  ;;  %p2925_p2 = scmp.lt.s32.totalorder %s2923_s25, %s2918_s22 }
  0x2d   : > { %p2922_p12 = pneg %p2921_p9  ;;  %p2926_p13 = por %p2925_p2, %p2924_p10 }
  0x2f   : > { %p2927_p0 = pnand %p2926_p13, %p2922_p12 }
  0x31   : > { %2930 = shalt.err (!%p2927_p0)
}
  0x32   : > { %s2931_s28 = scalar_lea.vmem %s3137_s18, 256  ;;  %s3019_s3 = smov [#allocation2]  }
  0x33   : > { %p2932_p1 = scmp.ne.s32.totalorder %s3137_s18, %s2931_s28  ;;  %s2936_s4 = sshll.u32 %s3019_s3, 4  ;;  %s2937_s4 = int_to_ptr.vmem [resolvable:$false] %s2936_s4 }
  0x34   : > { %s2938_s5 = scalar_lea.vmem %s2937_s4, 512  ;;  %p2939_p9 = scmp.lt.s32.totalorder %s3137_s18, %s2937_s4 }
  0x35   : > { %p2934_p6 = pnand %p2932_p1, %p2920_p7  ;;  %p2940_p3 = scmp.lt.s32.totalorder %s2938_s5, %s2931_s28 }
  0x37   : > { %p2935_p5 = pneg %p2934_p6  ;;  %p2941_p4 = por %p2940_p3, %p2939_p9 }
  0x39   : > { %p2942_p8 = pnand %p2941_p4, %p2935_p5 }
  0x3b   : > { %2945 = shalt.err (!%p2942_p8)
}
  0x3c   : > { %s3020_s6 = smov 128   ;;  %s3021_s7 = smov 8  }
  0x3d   : > { %2815 = dma.hbm_to_vmem [thread:$0]  (!%p3133_p11), %s3131_s8, 256, %s3137_s18, %s3139_s20, %s3020_s6, %s3020_s6, %s3021_s7  }
  0x3e   : > { %p4248_p1 = scmp.ne.s32.totalorder %s4243_s17, 0 }
  0x40   : > { %146 = sbr.rel (%p4248_p1) target bundleno = 3485 (0xd9d), region = 28 }
  0x45   : > { %s3163_s14 = sand.u32 1, %s3006_s10   ;;  %p4249_p4 = scmp.ne.s32.totalorder %s4241_s15, 0 }
  0x46   : > { %s2350_s22 = sshll.u32 %s3163_s14, 4  ;;  %s149_s23 = scalar_lea.sflag [#allocation3], %s3163_s14 }
  0x47   : > { %s3169_s24 = scalar_lea.vmem [#allocation2], %s2350_s22 }
  0x48   : > { %2989 = dma.done.wait (%p4249_p4), %s149_s23, 256  }
  0x49   : > { %2991 = vsyncadd (%p4249_p4), %s149_s23, 4294967040  ;;  %p4250_p6 = scmp.eq.s32.totalorder %s3068_s13, 0 }
  0x4b   : > { %2993 = dma.done.wait (%p4250_p6), [#allocation6], 1536   ;;  %p4251_p8 = pmov %p4250_p6 }
  0x4c   : > { %vm470_vm0 = vcmask 261120   ;;  %v3179_v0 = vld [vmem:[#allocation5 + $0x30] sm:$0xff]  ;;  %v3181_v1 = vld [vmem:[#allocation5 + $0x20] sm:$0xff]  ;;  %s3022_s15 = smov 80   ;;  %v178_v5 = vld [vmem:[%s3169_s24 + $0x8] sm:$0xff]  ;;  %v191_v6 = vlaneseq  ;;  %v4224_v13 = vmov 1.0  }
  0x4d   : > { %2995 = vsyncadd (%p4251_p8), [#allocation6], 4294965760  ;;  %2572 = vmatprep.subr.mxu1 %v3179_v0  ;;  %v177_v2 = vld [vmem:[%s3169_s24] sm:$0xff]  ;;  %vm4223_vm3 = vcmask 130048   ;;  %s3024_s17 = smov 96   ;;  %s3025_s8 = smov 88  }
  0x4e   : > { %2573 = vmatpush3.msra.mxu1 %v3179_v0  ;;  %v3186_v3 = vld [vmem:[#allocation5 + $0x10] sm:$0xff]  ;;  %2580 = vmatprep.mubr.msk.f32.mxu1 %vm470_vm0, %v177_v2  ;;  %v3192_v4 = vld [vmem:[#allocation5] sm:$0xff]  ;;  %v3201_v7 = vand.u32 127, %v191_v6  ;;  %v3203_v8 = vshrl.u32 %v191_v6, 7  ;;  %vm556_vm5 = vcmask 64512   ;;  %v4234_v26 = vmov 0.0  }
  0x4f   : > { %2574 = vmatprep.subr.mxu1 %v3181_v1  ;;  %386 = vrot.lane.b32.xlu0 %v177_v2, %s3022_s15  ;;  %s3027_s18 = smov 32   ;;  %s3028_s19 = smov 64  }
  0x50   : > { %2575 = vmatpush3.msra.mxu1 %v3181_v1  ;;  %v198_v9 = vand.u32 15, %v3201_v7  ;;  %v3207_v10 = vadd.s32 8, %v3203_v8  ;;  %v193_v16 = vshra.s32 %v3201_v7, 4  ;;  %v218_v28 = vand.u32 15, %v3203_v8  ;;  %s176_s20 = scalar_lea.vmem [#allocation7], %s2350_s22  ;;  %s2430_s26 = sshll.u32 %s3068_s13, 8 }
  0x51   : > { %2576 = vmatprep.subr.mxu1 %v3186_v3  ;;  %v3272_v29 = vadd.s32 16, %v3203_v8  ;;  %v3282_v34 = vadd.s32 24, %v3203_v8  ;;  %v3287_v37 = vadd.s32 32, %v3203_v8  ;;  %v3296_v41 = vadd.s32 40, %v3203_v8  ;;  %s2259_s25 = sshll.u32 %s176_s20, 4  ;;  %s4173_s3 = scalar_lea.hbm %s4218_s2, %s2430_s26  ;;  %s4168_s25 = int_to_ptr.vmem [resolvable:$true] %s2259_s25 }
  0x52   : > { %2577 = vmatpush3.msra.mxu1 %v3186_v3  ;;  %vm3210_vm1 = vcmp.eq.s32.totalorder %v198_v9, %v3207_v10  ;;  %vm3215_vm2 = vcmp.eq.s32.totalorder %v198_v9, %v3203_v8  ;;  %vm3235_vm4 = vcmp.eq.s32.totalorder %v193_v16, %v3203_v8  ;;  %v219_v33 = vand.u32 15, %v3207_v10  ;;  %s2246_s4 = scalar_lea.sflag [#allocation4], %s3163_s14  ;;  %s2946_s5 = scalar_lea.vmem %s4168_s25, 256 }
  0x53   : > { %2578 = vmatprep.subr.mxu1 %v3192_v4  ;;  %388 = vrot.lane.b32.xlu0 %v178_v5, %s3022_s15  ;;  %v3268_v27 = vsel %vm3210_vm1, 1.0, %v4234_v26  ;;  %v3277_v31 = vsel %vm3215_vm2, 1.0, %v4234_v26  ;;  %vm234_vm6 = vcmp.eq.s32.totalorder %v218_v28, %v3201_v7  ;;  %v220_v36 = vand.u32 15, %v3272_v29  ;;  %p2947_p3 = scmp.ne.s32.totalorder %s4168_s25, %s2946_s5  ;;  %p4400_p11 = scmp.ne.s32.totalorder %s4246_s30, 0 }
  0x54   : > { %2579 = vmatpush3.msra.mxu1 %v3192_v4  ;;  %2565 = vmatprep.subr.msk.mxu0 %vm3210_vm1, %v4224_v13  ;;  %v3291_v39 = vsel %vm234_vm6, 1.0, %v4234_v26  ;;  %vm235_vm7 = vcmp.eq.s32.totalorder %v219_v33, %v3201_v7  ;;  %v221_v40 = vand.u32 15, %v3282_v34  ;;  %v222_v42 = vand.u32 15, %v3287_v37  ;;  %s3029_s13 = smov [#allocation7]  }
  0x55   : > { %2581 = vmatmul.mubr.msk.f32.vlgmr.msra.gmra.mxu1 %vm470_vm0, %v178_v5  ;;  %2566 = vmatpush3.msk.msra.mxu0 %vm3210_vm1, %v4224_v13  ;;  %vm236_vm8 = vcmp.eq.s32.totalorder %v220_v36, %v3201_v7  ;;  %v3301_v43 = vadd.s32 48, %v3203_v8  ;;  %v3308_v44 = vsel %vm235_vm7, 1.0, %v4234_v26  ;;  %v223_v46 = vand.u32 15, %v3296_v41  ;;  %p2948_p7 = pnand %p2947_p3, %p4400_p11  ;;  %s2950_s6 = sshll.u32 %s3029_s13, 4  ;;  %s2951_s6 = int_to_ptr.vmem [resolvable:$false] %s2950_s6 }
  0x56   : > { %2567 = vmatprep.subr.msk.mxu0 %vm3215_vm2, %v4224_v13  ;;  %2595 = vmatprep.subr.msk.mxu1 %vm3235_vm4, %v4224_v13  ;;  %v3311_v45 = vsel %vm236_vm8, 1.0, %v4234_v26  ;;  %vm237_vm9 = vcmp.eq.s32.totalorder %v221_v40, %v3201_v7  ;;  %v3316_v47 = vadd.s32 56, %v3203_v8  ;;  %vm238_vm10 = vcmp.eq.s32.totalorder %v222_v42, %v3201_v7  ;;  %s2952_s7 = scalar_lea.vmem %s2951_s6, 512  ;;  %p2953_p10 = scmp.lt.s32.totalorder %s4168_s25, %s2951_s6 }
  0x57   : > { %2568 = vmatpush3.msk.msra.mxu0 %vm3215_vm2, %v4224_v13  ;;  %2596 = vmatpush3.msk.msra.mxu1 %vm3235_vm4, %v4224_v13  ;;  %v224_v48 = vand.u32 15, %v3301_v43  ;;  %v3321_v49 = vadd.s32 64, %v3203_v8  ;;  %v3328_v50 = vsel %vm237_vm9, 1.0, %v4234_v26  ;;  %v3331_v51 = vsel %vm238_vm10, 1.0, %v4234_v26  ;;  %p2949_p12 = pneg %p2948_p7  ;;  %p2954_p2 = scmp.lt.s32.totalorder %s2952_s7, %s2946_s5 }
  0x58   : > { %2583 = vmatprep.subr.msk.mxu0 %vm3235_vm4, %v4224_v13  ;;  %vm239_vm11 = vcmp.eq.s32.totalorder %v223_v46, %v3201_v7  ;;  %v225_v52 = vand.u32 15, %v3316_v47  ;;  %v3336_v53 = vadd.s32 72, %v3203_v8  ;;  %v3341_v55 = vadd.s32 80, %v3203_v8 }
  0x59   : > { %vm240_vm12 = vcmp.eq.s32.totalorder %v224_v48, %v3201_v7  ;;  %v226_v54 = vand.u32 15, %v3321_v49  ;;  %v3348_v56 = vsel %vm239_vm11, 1.0, %v4234_v26  ;;  %v3356_v59 = vadd.s32 88, %v3203_v8  ;;  %p2955_p13 = por %p2954_p2, %p2953_p10 }
  0x5a   : > { %v3351_v57 = vsel %vm240_vm12, 1.0, %v4234_v26  ;;  %vm241_vm13 = vcmp.eq.s32.totalorder %v225_v52, %v3201_v7  ;;  %v227_v58 = vand.u32 15, %v3336_v53  ;;  %v228_v60 = vand.u32 15, %v3341_v55 }
  0x5b   : > { %4259 = vst [vmem:[#allocation12_spill] sm:$0xff] %v3351_v57  ;;  %vm242_vm14 = vcmp.eq.s32.totalorder %v226_v54, %v3201_v7  ;;  %v3361_v61 = vadd.s32 96, %v3203_v8  ;;  %v3368_v62 = vsel %vm241_vm13, 1.0, %v4234_v26  ;;  %v229_v2 = vand.u32 15, %v3356_v59  ;;  %p2956_p0 = pnand %p2955_p13, %p2949_p12 }
  0x5c   : > { %4260 = vst [vmem:[#allocation13_spill] sm:$0xff] %v3368_v62  ;;  %v3371_v63 = vsel %vm242_vm14, 1.0, %v4234_v26  ;;  %vm243_vm15 = vcmp.eq.s32.totalorder %v227_v58, %v3201_v7  ;;  %v3376_v5 = vadd.s32 104, %v3203_v8  ;;  %vm244_vm1 = vcmp.eq.s32.totalorder %v228_v60, %v3201_v7 }
  0x5d   : > { %4261 = vst [vmem:[#allocation14_spill] sm:$0xff] %v3371_v63  ;;  %v230_v6 = vand.u32 15, %v3361_v61  ;;  %v3381_v9 = vadd.s32 112, %v3203_v8  ;;  %v3388_v11 = vsel %vm243_vm15, 1.0, %v4234_v26  ;;  %v3391_v12 = vsel %vm244_vm1, 1.0, %v4234_v26 }
  0x5e   : > { %4262 = vst [vmem:[#allocation15_spill] sm:$0xff] %v3388_v11  ;;  %4263 = vst [vmem:[#allocation16_spill] sm:$0xff] %v3391_v12  ;;  %vm245_vm2 = vcmp.eq.s32.totalorder %v229_v2, %v3201_v7  ;;  %vm285_vm12 = vcmp.lt.s32.totalorder %v3201_v7, 32  ;;  %vm334_vm1 = vcmp.ge.s32.totalorder %v3201_v7, 32 }
  0x5f   : > { %vm246_vm6 = vcmp.eq.s32.totalorder %v230_v6, %v3201_v7  ;;  %v232_v16 = vand.u32 15, %v3381_v9 }
  0x61   : > { %vm248_vm8 = vcmp.eq.s32.totalorder %v232_v16, %v3201_v7 }
  0xc1   : > { %v387_v14 = vpop.permute.xlu0 %386 }
  0xc2   : > { %2569 = vmatprep.mubr.msk.f32.mxu0 %vm4223_vm3, %v387_v14  ;;  %v231_v14 = vand.u32 15, %v3376_v5 }
  0xc4   : > { %vm247_vm7 = vcmp.eq.s32.totalorder %v231_v14, %v3201_v7  ;;  %v282_v14 = vshra.s32 %v3376_v5, 4  ;;  %v280_v5 = vshra.s32 %v3356_v59, 4 }
  0xc5   : > { %v389_v15 = vpop.permute.xlu0 %388 }
  0xc6   : > { %2570 = vmatmul.mubr.msk.f32.vlgmr.msra.gmra.mxu0 %vm4223_vm3, %v389_v15  ;;  %v217_v15 = vadd.s32 120, %v3203_v8 }
  0xc7   : > { %2584 = vmatpush3.msk.msra.mxu0 %vm3235_vm4, %v4224_v13 }
 0x115   : > { %v2582_v18 = vpop.f32.mrf.mxu1 }
 0x117   : > { %v541_v19 = vpop.f32.mrf.mxu1 }
 0x118   : > { %716 = vrot.lane.b32.xlu0 %v541_v19, %s3024_s17  ;;  %552 = vrot.lane.b32.xlu1 %v541_v19, %s3025_s8 }
 0x11c   : > { %554 = vrot.lane.b32.xlu1 %v2582_v18, %s3025_s8 }
 0x120   : > { %718 = vrot.lane.b32.xlu1 %v2582_v18, %s3024_s17 }
 0x186   : > { %v3261_v24 = vpop.f32.mrf.mxu0 }
 0x188   : > { %v3263_v25 = vpop.f32.mrf.mxu0 }
 0x189   : > { %4258 = vst [vmem:[#allocation11_spill] sm:$0xff] %v3263_v25 }
 0x18a   : > { %v717_v20 = vpop.permute.xlu0 %716  ;;  %v553_v21 = vpop.permute.xlu1 %552 }
 0x18b   : > { %2585 = vmatprep.mubr.msk.f32.mxu0 %vm556_vm5, %v553_v21  ;;  %2597 = vmatprep.mubr.msk.f32.mxu1 %vm556_vm5, %v717_v20  ;;  %v233_v20 = vand.u32 15, %v217_v15  ;;  %v3415_v21 = vsel %vm247_vm7, 1.0, %v4234_v26 }
 0x18c   : > { %4266 = vst [vmem:[#allocation19_spill] sm:$0xff] %v3415_v21 }
 0x18d   : > { %vm249_vm9 = vcmp.eq.s32.totalorder %v233_v20, %v3201_v7  ;;  %v284_v20 = vshra.s32 %v217_v15, 4 }
 0x18e   : > { %v555_v22 = vpop.permute.xlu1 %554 }
 0x18f   : > { %2586 = vmatmul.mubr.msk.f32.vlgmr.msra.gmra.mxu0 %vm556_vm5, %v555_v22  ;;  %v3418_v22 = vsel %vm248_vm8, 1.0, %v4234_v26 }
 0x190   : > { %2592 = vmatprep.mubr.msk.f32.mxu0 %vm4223_vm3, %v4224_v13  ;;  %4267 = vst [vmem:[#allocation20_spill] sm:$0xff] %v3418_v22 }
 0x192   : > { %v719_v23 = vpop.permute.xlu1 %718 }
 0x193   : > { %2598 = vmatmul.mubr.msk.f32.vlgmr.msra.gmra.mxu1 %vm556_vm5, %v719_v23  ;;  %v3426_v23 = vsel %vm249_vm9, 1.0, %v4234_v26 }
 0x194   : > { %4268 = vst [vmem:[#allocation21_spill] sm:$0xff] %v3426_v23 }
 0x24f   : > { %v2587_v30 = vpop.f32.mrf.mxu0 }
 0x250   : > { %v637_v32 = vmul.f32 %v2587_v30, %v3268_v27 }
 0x251   : > { %v627_v35 = vpop.f32.mrf.mxu0 }
 0x252   : > { %v636_v38 = vmul.f32 %v627_v35, %v3277_v31  ;;  %2588 = vmatprep.subr.mxu0 %v637_v32 }
 0x253   : > { %2589 = vmatpush3.msra.mxu0 %v637_v32  ;;  %v3430_v28 = vpop.f32.mrf.mxu1 }
 0x254   : > { %2590 = vmatprep.subr.mxu0 %v636_v38 }
 0x255   : > { %2591 = vmatpush3.msra.mxu0 %v636_v38  ;;  %v790_v32 = vpop.f32.mrf.mxu1 }
 0x256   : > { %2593 = vmatmul.mubr.msk.f32.vlgmr.msra.gmra.mxu0 %vm4223_vm3, %v4224_v13  ;;  %2600 = vmatprep.subr.mxu0 %v2582_v18 }
 0x257   : > { %2601 = vmatpush3.msra.mxu0 %v2582_v18  ;;  %2604 = vmatprep.mubr.msk.f32.mxu0 %vm4223_vm3, %v3291_v39  ;;  %v3403_v18 = vsel %vm245_vm2, 1.0, %v4234_v26 }
 0x258   : > { %2602 = vmatprep.subr.mxu0 %v541_v19  ;;  %4264 = vst [vmem:[#allocation17_spill] sm:$0xff] %v3403_v18 }
 0x259   : > { %2603 = vmatpush3.msra.mxu0 %v541_v19  ;;  %v3406_v19 = vsel %vm246_vm6, 1.0, %v4234_v26 }
 0x25a   : > { %2605 = vmatmul.mubr.msk.f32.vlgmr.msra.gmra.mxu0 %vm4223_vm3, %v3308_v44  ;;  %4265 = vst [vmem:[#allocation18_spill] sm:$0xff] %v3406_v19 }
 0x25b   : > { %2607 = vmatprep.mubr.msk.f32.mxu0 %vm4223_vm3, %v3311_v45 }
 0x25e   : > { %2608 = vmatmul.mubr.msk.f32.gmra.mxu0 %vm4223_vm3, %v3328_v50 }
 0x25f   : > { %2610 = vmatprep.mubr.msk.f32.mxu0 %vm4223_vm3, %v3331_v51 }
 0x262   : > { %2611 = vmatmul.mubr.msk.f32.gmra.mxu0 %vm4223_vm3, %v3348_v56 }
 0x263   : > { %2613 = vmatprep.mubr.msk.f32.mxu0 %vm4223_vm3, %v3351_v57 }
 0x266   : > { %2614 = vmatmul.mubr.msk.f32.gmra.mxu0 %vm4223_vm3, %v3368_v62 }
 0x267   : > { %2616 = vmatprep.mubr.msk.f32.mxu0 %vm4223_vm3, %v3371_v63 }
 0x26a   : > { %2617 = vmatmul.mubr.msk.f32.gmra.mxu0 %vm4223_vm3, %v3388_v11  ;;  %v275_v11 = vshra.s32 %v3301_v43, 4 }
 0x26b   : > { %2619 = vmatprep.mubr.msk.f32.mxu0 %vm4223_vm3, %v3391_v12  ;;  %v276_v12 = vshra.s32 %v3316_v47, 4 }
 0x26e   : > { %2620 = vmatmul.mubr.msk.f32.gmra.mxu0 %vm4223_vm3, %v3403_v18 }
 0x26f   : > { %2622 = vmatprep.mubr.msk.f32.mxu0 %vm4223_vm3, %v3406_v19 }
 0x272   : > { %2623 = vmatmul.mubr.msk.f32.gmra.mxu0 %vm4223_vm3, %v3415_v21 }
 0x273   : > { %2625 = vmatprep.mubr.msk.f32.mxu0 %vm4223_vm3, %v3418_v22 }
 0x276   : > { %2626 = vmatmul.mubr.msk.f32.gmra.mxu0 %vm4223_vm3, %v3426_v23 }
 0x316   : > { %v3432_v30 = vpop.f32.mrf.mxu0 }
 0x318   : > { %v707_v33 = vpop.f32.mrf.mxu0 }
 0x319   : > { %v791_v35 = vadd.f32 %v790_v32, %v707_v33  ;;  %v3455_v32 = vshra.s32 %v3201_v7, 2 }
 0x31a   : > { %v3434_v36 = vpop.f32.mrf.mxu0 }
 0x31b   : > { %v799_v38 = vmul.f32 0.2, %v791_v35  ;;  %vm299_vm10 = vcmp.eq.s32.totalorder %v3455_v32, %v282_v14  ;;  %vm301_vm11 = vcmp.eq.s32.totalorder %v3455_v32, %v284_v20  ;;  %vm297_vm9 = vcmp.eq.s32.totalorder %v3455_v32, %v280_v5 }
 0x31c   : > { %v3436_v40 = vpop.f32.mrf.mxu0  ;;  %vm3475_vm14 = vmand %vm285_vm12, %vm299_vm10 }
 0x31d   : > { %v801_v42 = vmax.f32 %v791_v35, %v799_v38  ;;  %v283_v35 = vshra.s32 %v3381_v9, 4  ;;  %v3461_v38 = vadd.s32 4294967264, %v3201_v7  ;;  %vm317_vm6 = vmand %vm285_vm12, %vm301_vm11  ;;  %v3527_v23 = vsel %vm3475_vm14, 1.0, %v4234_v26 }
 0x31e   : > { %v3438_v46 = vpop.f32.mrf.mxu0 }
 0x31f   : > { %v803_v48 = vadd.f32 %v801_v42, %v3263_v25  ;;  %v281_v42 = vshra.s32 %v3361_v61, 4  ;;  %vm351_vm13 = vcmp.eq.s32.totalorder %v3461_v38, %v284_v20  ;;  %vm300_vm15 = vcmp.eq.s32.totalorder %v3455_v32, %v283_v35 }
 0x320   : > { %v3441_v52 = vpop.f32.mrf.mxu0  ;;  %v279_v61 = vshra.s32 %v3341_v55, 4  ;;  %vm367_vm7 = vmand %vm334_vm1, %vm351_vm13  ;;  %vm350_vm8 = vcmp.eq.s32.totalorder %v3461_v38, %v283_v35  ;;  %v278_v20 = vshra.s32 %v3336_v53, 4  ;;  %v277_v55 = vshra.s32 %v3321_v49, 4 }
 0x321   : > { %v805_v54 = vmul.f32 1.442695, %v803_v48  ;;  %vm298_vm2 = vcmp.eq.s32.totalorder %v3455_v32, %v281_v42  ;;  %vm316_vm10 = vmand %vm285_vm12, %vm300_vm15  ;;  %vm3494_vm3 = vcmp.eq.s32.totalorder %v3461_v38, %v282_v14  ;;  %v3505_v53 = vsel %vm317_vm6, 1.0, %v4234_v26 }
 0x322   : > { %v3443_v58 = vpop.f32.mrf.mxu0  ;;  %vm3500_vm11 = vmand %vm285_vm12, %vm298_vm2  ;;  %4275 = vst [vmem:[#allocation22_spill] sm:$0xff] %v3505_v53  ;;  %vm3508_vm13 = vcmp.eq.s32.totalorder %v3455_v32, %v279_v61  ;;  %vm3530_vm6 = vcmp.eq.s32.totalorder %v3461_v38, %v281_v42  ;;  %v3535_v21 = vsel %vm367_vm7, 1.0, %v4234_v26  ;;  %v3538_v18 = vsel %vm316_vm10, 1.0, %v4234_v26 }
 0x323   : > { %2870 = vpow2.f32 %v805_v54  ;;  %vm3514_vm15 = vmand %vm334_vm1, %vm350_vm8  ;;  %vm295_vm8 = vcmp.eq.s32.totalorder %v3455_v32, %v278_v20  ;;  %vm3553_vm7 = vcmp.eq.s32.totalorder %v3455_v32, %v277_v55  ;;  %v3582_v25 = vadd.f32 %v3430_v28, %v3432_v30 }
 0x324   : > { %v3445_v60 = vpop.f32.mrf.mxu0  ;;  %vm3520_vm2 = vmand %vm285_vm12, %vm297_vm9  ;;  %vm3558_vm9 = vcmp.eq.s32.totalorder %v3461_v38, %v280_v5 }
 0x325   : > { %vm3547_vm14 = vmand %vm334_vm1, %vm3494_vm3 }
 0x326   : > { %v3447_v2 = vpop.f32.mrf.mxu0  ;;  %vm3566_vm3 = vmand %vm285_vm12, %vm3508_vm13  ;;  %vm3607_vm13 = vcmp.eq.s32.totalorder %v3461_v38, %v279_v61 }
 0x327   : > { %vm3589_vm10 = vmand %vm334_vm1, %vm3530_vm6  ;;  %vm3634_vm6 = vcmp.eq.s32.totalorder %v3461_v38, %v278_v20  ;;  %v800_v20 = vmul.f32 0.2, %v3582_v25 }
 0x328   : > { %v3449_v6 = vpop.f32.mrf.mxu0 }
 0x32a   : > { %v3452_v16 = vpop.f32.mrf.mxu0 }
 0x32c   : > { %v3457_v33 = vpop.f32.mrf.mxu0 }
 0x32e   : > { %v3465_v48 = vpop.f32.mrf.mxu0 }
 0x330   : > { %v2871_v15 = vpop.eup %2870  ;;  %v3471_v54 = vpop.f32.mrf.mxu0 }
 0x331   : > { %2660 = vmatprep.mubr.f32.mxu1 %v2871_v15  ;;  %v4292_v15 = vmov 0.0  }
 0x332   : > { %v2624_v59 = vpop.f32.mrf.mxu0  ;;  %v3578_v5 = vsel %vm3514_vm15, 1.0, %v4292_v15  ;;  %v3604_v22 = vsel %vm3520_vm2, 1.0, %v4292_v15  ;;  %v3614_v30 = vsel %vm3547_vm14, 1.0, %v4292_v15  ;;  %vm3618_vm15 = vcmp.eq.s32.totalorder %v3455_v32, %v276_v12  ;;  %vm3626_vm2 = vmand %vm334_vm1, %vm3558_vm9 }
 0x333   : > { %v1015_v63 = vmul.f32 %v2624_v59, %v3527_v23  ;;  %4299 = vst [vmem:[#allocation23_spill] sm:$0xff] %v3614_v30  ;;  %v274_v59 = vshra.s32 %v3296_v41, 4  ;;  %v273_v41 = vshra.s32 %v3287_v37, 4  ;;  %v3654_v37 = vsel %vm3589_vm10, 1.0, %v4292_v15  ;;  %vm3677_vm9 = vmand %vm285_vm12, %vm3618_vm15 }
 0x334   : > { %v983_v35 = vpop.f32.mrf.mxu0  ;;  %vm3658_vm14 = vcmp.eq.s32.totalorder %v3455_v32, %v275_v11 }
 0x335   : > { %vm3698_vm10 = vcmp.eq.s32.totalorder %v3455_v32, %v274_v59  ;;  %vm3723_vm15 = vmand %vm285_vm12, %vm3658_vm14  ;;  %vm3768_vm14 = vcmp.eq.s32.totalorder %v3461_v38, %v275_v11 }
 0x336   : > { %v2627_v19 = vpop.f32.mrf.mxu0 }
 0x337   : > { %v1017_v9 = vmul.f32 %v2627_v19, %v3505_v53  ;;  %v3573_v19 = vsel %vm3500_vm11, 1.0, %v4292_v15  ;;  %vm3597_vm11 = vmand %vm285_vm12, %vm295_vm8 }
 0x338   : > { %v993_v53 = vpop.f32.mrf.mxu0  ;;  %v1014_v14 = vmul.f32 %v983_v35, %v3573_v19  ;;  %vm3642_vm8 = vmand %vm285_vm12, %vm3553_vm7  ;;  %v3649_v35 = vsel %vm3566_vm3, 1.0, %v4292_v15  ;;  %vm3687_vm3 = vcmp.eq.s32.totalorder %v3461_v38, %v277_v55 }
 0x339   : > { %v1033_v62 = vadd.f32 %v1017_v9, %v3535_v21  ;;  %v1016_v49 = vmul.f32 %v993_v53, %v3538_v18  ;;  %vm3668_vm7 = vmand %vm334_vm1, %vm3607_vm13  ;;  %v272_v53 = vshra.s32 %v3282_v34, 4  ;;  %v1012_v55 = vmul.f32 %v3471_v54, %v3649_v35 }
 0x33a   : > { %v1030_v61 = vadd.f32 %v1014_v14, %v3654_v37  ;;  %v271_v34 = vshra.s32 %v3272_v29, 4  ;;  %vm3715_vm13 = vcmp.eq.s32.totalorder %v3461_v38, %v276_v12  ;;  %v3730_v54 = vsel %vm3642_vm8, 1.0, %v4292_v15  ;;  %vm3758_vm8 = vmand %vm285_vm12, %vm3698_vm10 }
 0x33b   : > { %v1032_v42 = vadd.f32 %v1016_v49, %v3578_v5  ;;  %2628 = vmatprep.subr.mxu1 %v1033_v62  ;;  %v1013_v49 = vmul.f32 %v3465_v48, %v3604_v22  ;;  %v3684_v48 = vsel %vm3597_vm11, 1.0, %v4292_v15  ;;  %vm3706_vm11 = vmand %vm334_vm1, %vm3634_vm6  ;;  %v3735_v29 = vsel %vm3668_vm7, 1.0, %v4292_v15 }
 0x33c   : > { %2629 = vmatpush3.msra.mxu1 %v1033_v62  ;;  %v1031_v62 = vadd.f32 %v1015_v63, %v3614_v30  ;;  %v3694_v63 = vsel %vm3626_vm2, 1.0, %v4292_v15  ;;  %v802_v12 = vmax.f32 %v3582_v25, %v800_v20  ;;  %vm3739_vm2 = vcmp.eq.s32.totalorder %v3455_v32, %v273_v41  ;;  %vm3749_vm6 = vmand %vm334_vm1, %vm3687_vm3 }
 0x33d   : > { %2630 = vmatprep.subr.mxu1 %v1032_v42  ;;  %v1011_v26 = vmul.f32 %v3452_v16, %v3684_v48  ;;  %v1029_v47 = vadd.f32 %v1013_v49, %v3694_v63  ;;  %v3765_v16 = vsel %vm3677_vm9, 1.0, %v4292_v15  ;;  %v3775_v30 = vsel %vm3706_vm11, 1.0, %v4292_v15  ;;  %vm3787_vm9 = vmand %vm334_vm1, %vm3715_vm13 }
 0x33e   : > { %2631 = vmatpush3.msra.mxu1 %v1032_v42  ;;  %v270_v49 = vshra.s32 %v3207_v10, 4  ;;  %vm3779_vm7 = vcmp.eq.s32.totalorder %v3455_v32, %v272_v53  ;;  %v1010_v13 = vmul.f32 %v3457_v33, %v3730_v54  ;;  %v1028_v28 = vadd.f32 %v1012_v55, %v3735_v29  ;;  %vm3804_vm10 = vmand %vm285_vm12, %vm3739_vm2 }
 0x33f   : > { %2632 = vmatprep.subr.mxu1 %v1031_v62  ;;  %v269_v10 = vshra.s32 %v3203_v8, 4  ;;  %vm3796_vm3 = vcmp.eq.s32.totalorder %v3461_v38, %v274_v59  ;;  %v3811_v33 = vsel %vm3723_vm15, 1.0, %v4292_v15  ;;  %v3816_v59 = vsel %vm3749_vm6, 1.0, %v4292_v15  ;;  %vm3830_vm13 = vmand %vm334_vm1, %vm3768_vm14 }
 0x340   : > { %2633 = vmatpush3.msra.mxu1 %v1031_v62  ;;  %v804_v55 = vadd.f32 %v3261_v24, %v802_v12  ;;  %vm3820_vm11 = vcmp.eq.s32.totalorder %v3455_v32, %v271_v34  ;;  %v1009_v14 = vmul.f32 %v3447_v2, %v3765_v16  ;;  %v1027_v43 = vadd.f32 %v1011_v26, %v3775_v30  ;;  %vm3839_vm15 = vmand %vm285_vm12, %vm3779_vm7 }
 0x341   : > { %2634 = vmatprep.subr.mxu1 %v1030_v61  ;;  %v3846_v2 = vsel %vm3758_vm8, 1.0, %v4292_v15  ;;  %vm3849_vm2 = vcmp.eq.s32.totalorder %v3461_v38, %v273_v41  ;;  %v3856_v26 = vsel %vm3787_vm9, 1.0, %v4292_v15  ;;  %vm3859_vm6 = vcmp.eq.s32.totalorder %v3455_v32, %v270_v49  ;;  %vm3867_vm8 = vmand %vm334_vm1, %vm3796_vm3 }
 0x342   : > { %2635 = vmatpush3.msra.mxu1 %v1030_v61  ;;  %v1008_v25 = vmul.f32 %v3449_v6, %v3811_v33  ;;  %v1026_v62 = vadd.f32 %v1010_v13, %v3816_v59  ;;  %vm3875_vm14 = vcmp.eq.s32.totalorder %v3461_v38, %v272_v53  ;;  %vm3883_vm7 = vmand %vm285_vm12, %vm3820_vm11  ;;  %v3890_v6 = vsel %vm3804_vm10, 1.0, %v4292_v15 }
 0x343   : > { %2636 = vmatprep.subr.mxu1 %v1029_v47  ;;  %v3895_v53 = vsel %vm3830_vm13, 1.0, %v4292_v15  ;;  %v807_v13 = vmul.f32 1.442695, %v804_v55  ;;  %vm3898_vm9 = vcmp.eq.s32.totalorder %v3455_v32, %v269_v10  ;;  %v1007_v42 = vmul.f32 %v3443_v58, %v3846_v2  ;;  %vm356_vm3 = vmand %vm334_vm1, %vm3849_vm2 }
 0x344   : > { %2637 = vmatpush3.msra.mxu1 %v1029_v47  ;;  %v1025_v61 = vadd.f32 %v1009_v14, %v3856_v26  ;;  %vm3913_vm10 = vmand %vm285_vm12, %vm3859_vm6  ;;  %v3920_v58 = vsel %vm3839_vm15, 1.0, %v4292_v15  ;;  %vm338_vm11 = vcmp.eq.s32.totalorder %v3461_v38, %v271_v34  ;;  %v3926_v14 = vsel %vm3867_vm8, 1.0, %v4292_v15 }
 0x345   : > { %2638 = vmatprep.subr.mxu1 %v1028_v28  ;;  %vm3932_vm13 = vmand %vm334_vm1, %vm3875_vm14  ;;  %v1024_v12 = vadd.f32 %v1008_v25, %v3895_v53  ;;  %vm337_vm15 = vcmp.eq.s32.totalorder %v3461_v38, %v270_v49  ;;  %v3951_v47 = vsel %vm3883_vm7, 1.0, %v4292_v15  ;;  %2872 = vpow2.f32 %v807_v13 }
 0x346   : > { %2639 = vmatpush3.msra.mxu1 %v1028_v28  ;;  %vm3944_vm2 = vmand %vm285_vm12, %vm3898_vm9  ;;  %v1005_v49 = vmul.f32 %v3438_v46, %v3920_v58  ;;  %v1023_v20 = vadd.f32 %v1007_v42, %v3926_v14  ;;  %v3964_v41 = vsel %vm3913_vm10, 1.0, %v4292_v15  ;;  %vm336_vm12 = vcmp.eq.s32.totalorder %v3461_v38, %v269_v10 }
 0x347   : > { %2640 = vmatprep.subr.mxu1 %v1027_v43  ;;  %vm354_vm6 = vmand %vm334_vm1, %vm338_vm11  ;;  %v3970_v25 = vsel %vm3932_vm13, 1.0, %v4292_v15  ;;  %v1004_v46 = vmul.f32 %v3441_v52, %v3951_v47  ;;  %v3980_v11 = vsel %vm3944_vm2, 1.0, %v4292_v15  ;;  %v1003_v10 = vmul.f32 %v3434_v36, %v3964_v41 }
 0x348   : > { %2641 = vmatpush3.msra.mxu1 %v1027_v43  ;;  %v1006_v43 = vmul.f32 %v3445_v60, %v3890_v6  ;;  %v3954_v60 = vsel %vm356_vm3, 1.0, %v4292_v15  ;;  %vm353_vm8 = vmand %vm334_vm1, %vm337_vm15  ;;  %v3983_v38 = vsel %vm354_vm6, 1.0, %v4292_v15  ;;  %v1021_v52 = vadd.f32 %v1005_v49, %v3970_v25 }
 0x349   : > { %2642 = vmatprep.subr.mxu1 %v1026_v62  ;;  %vm352_vm14 = vmand %vm334_vm1, %vm336_vm12  ;;  %v3991_v28 = vsel %vm353_vm8, 1.0, %v4292_v15  ;;  %v1002_v13 = vmul.f32 %v3436_v40, %v3980_v11  ;;  %v1020_v57 = vadd.f32 %v1004_v46, %v3983_v38  ;;  %vm267_vm1 = vcmp.eq.s32.totalorder %v3455_v32, %v3203_v8  ;;  %v4032_v46 = vld [vmem:[#allocation5 + $0x40] sm:$0xff]  ;;  %v4391_v32 = vld [vmem:[#allocation21_spill] sm:$0xff] }
 0x34a   : > { %2643 = vmatpush3.msra.mxu1 %v1026_v62  ;;  %v1022_v62 = vadd.f32 %v1006_v43, %v3954_v60  ;;  %v3997_v42 = vsel %vm352_vm14, 1.0, %v4292_v15  ;;  %v1019_v7 = vadd.f32 %v1003_v10, %v3991_v28  ;;  %v4364_v40 = vmov 1.0   ;;  %v4379_v8 = vld [vmem:[#allocation15_spill] sm:$0xff] }
 0x34b   : > { %2644 = vmatprep.subr.mxu1 %v1025_v61  ;;  %v1018_v36 = vadd.f32 %v1002_v13, %v3997_v42  ;;  %2663 = vmatprep.subr.msk.mxu0 %vm267_vm1, %v4364_v40  ;;  %vm4365_vm7 = vcmask 130048  }
 0x34c   : > { %2645 = vmatpush3.msra.mxu1 %v1025_v61  ;;  %2664 = vmatpush3.msk.msra.mxu0 %vm267_vm1, %v4364_v40 }
 0x34d   : > { %2646 = vmatprep.subr.mxu1 %v1024_v12  ;;  %2679 = vmatprep.subr.msk.mxu0 %vm3235_vm4, %v4364_v40 }
 0x34e   : > { %2647 = vmatpush3.msra.mxu1 %v1024_v12 }
 0x34f   : > { %2648 = vmatprep.subr.mxu1 %v1023_v20 }
 0x350   : > { %2649 = vmatpush3.msra.mxu1 %v1023_v20 }
 0x351   : > { %2650 = vmatprep.subr.mxu1 %v1022_v62 }
 0x352   : > { %2651 = vmatpush3.msra.mxu1 %v1022_v62  ;;  %v2873_v61 = vpop.eup %2872 }
 0x353   : > { %2652 = vmatprep.subr.mxu1 %v1021_v52 }
 0x354   : > { %2653 = vmatpush3.msra.mxu1 %v1021_v52  ;;  %v4034_v52 = vld [vmem:[#allocation5 + $0x50] sm:$0xff] }
 0x355   : > { %2654 = vmatprep.subr.mxu1 %v1020_v57 }
 0x356   : > { %2655 = vmatpush3.msra.mxu1 %v1020_v57 }
 0x357   : > { %2656 = vmatprep.subr.mxu1 %v1019_v7 }
 0x358   : > { %2657 = vmatpush3.msra.mxu1 %v1019_v7 }
 0x359   : > { %2658 = vmatprep.subr.mxu1 %v1018_v36 }
 0x35a   : > { %2659 = vmatpush3.msra.mxu1 %v1018_v36 }
 0x35b   : > { %2661 = vmatmul.mubr.f32.vlgmr.msra.gmra.mxu1 %v2873_v61 }
 0x41b   : > { %v2662_v15 = vpop.f32.mrf.mxu1 }
 0x41c   : > { %1113 = vrot.lane.b32.xlu1 %v2662_v15, %s3024_s17 }
 0x41d   : > { %v1100_v55 = vpop.f32.mrf.mxu1 }
 0x41e   : > { %1111 = vrot.lane.b32.xlu0 %v1100_v55, %s3024_s17 }
 0x420   : > { %1208 = vrot.lane.b32.xlu1 %v3181_v1, %s3022_s15 }
 0x422   : > { %1210 = vrot.lane.b32.xlu0 %v3179_v0, %s3022_s15 }
 0x424   : > { %1204 = vrot.lane.b32.xlu1 %v3192_v4, %s3022_s15 }
 0x426   : > { %1206 = vrot.lane.b32.xlu0 %v3186_v3, %s3022_s15 }
 0x48e   : > { %v1114_v43 = vpop.permute.xlu1 %1113 }
 0x490   : > { %v1112_v9 = vpop.permute.xlu0 %1111 }
 0x491   : > { %2665 = vmatprep.mubr.msk.f32.mxu0 %vm556_vm5, %v1112_v9 }
 0x492   : > { %2666 = vmatmul.mubr.msk.f32.vlgmr.msra.gmra.mxu0 %vm556_vm5, %v1114_v43  ;;  %v1209_v12 = vpop.permute.xlu1 %1208 }
 0x493   : > { %2680 = vmatpush3.msk.msra.mxu0 %vm3235_vm4, %v4364_v40 }
 0x494   : > { %v1211_v1 = vpop.permute.xlu0 %1210 }
 0x495   : > { %2668 = vmatprep.subr.mxu1 %v1211_v1 }
 0x496   : > { %2669 = vmatpush3.msra.mxu1 %v1211_v1  ;;  %v1205_v4 = vpop.permute.xlu1 %1204 }
 0x497   : > { %2670 = vmatprep.subr.mxu1 %v1209_v12 }
 0x498   : > { %2671 = vmatpush3.msra.mxu1 %v1209_v12  ;;  %v1207_v0 = vpop.permute.xlu0 %1206 }
 0x499   : > { %2672 = vmatprep.subr.mxu1 %v1207_v0 }
 0x49a   : > { %2673 = vmatpush3.msra.mxu1 %v1207_v0 }
 0x49b   : > { %2674 = vmatprep.subr.mxu1 %v1205_v4 }
 0x49c   : > { %2675 = vmatpush3.msra.mxu1 %v1205_v4 }
 0x49d   : > { %2691 = vmatprep.subr.msk.mxu1 %vm3235_vm4, %v4364_v40 }
 0x552   : > { %v2667_v3 = vpop.f32.mrf.mxu0 }
 0x553   : > { %2874 = vrcp.f32 %v2667_v3 }
 0x554   : > { %v1185_v34 = vpop.f32.mrf.mxu0 }
 0x555   : > { %2876 = vrcp.f32 %v1185_v34 }
 0x560   : > { %v2875_v49 = vpop.eup %2874 }
 0x561   : > { %v1197_v62 = vmul.f32 %v2875_v49, %v2662_v15 }
 0x562   : > { %v2877_v20 = vpop.eup %2876 }
 0x563   : > { %v1195_v10 = vmul.f32 %v2877_v20, %v1100_v55  ;;  %v1199_v57 = vadd.f32 %v1197_v62, %v4034_v52 }
 0x565   : > { %v1198_v13 = vadd.f32 %v1195_v10, %v4032_v46 }
 0x567   : > { %2676 = vmatprep.mubr.msk.f32.mxu1 %vm470_vm0, %v1198_v13 }
 0x568   : > { %2677 = vmatmul.mubr.msk.f32.vlgmr.msra.gmra.mxu1 %vm470_vm0, %v1199_v57  ;;  %v4393_v57 = vld [vmem:[#allocation11_spill] sm:$0xff] }
 0x569   : > { %2692 = vmatpush3.msk.msra.mxu1 %vm3235_vm4, %v4364_v40  ;;  %vm4366_vm4 = vmmov %vm4365_vm7 }
 0x56a   : > { %vm4367_vm9 = vmmov %vm4366_vm4 }
 0x56b   : > { %vm4368_vm3 = vmmov %vm4366_vm4 }
 0x56c   : > { %vm4369_vm10 = vmmov %vm4368_vm3 }
 0x56d   : > { %vm4370_vm11 = vmmov %vm4368_vm3 }
 0x56e   : > { %vm4371_vm13 = vmmov %vm4368_vm3 }
 0x56f   : > { %vm4372_vm15 = vmmov %vm4368_vm3 }
 0x570   : > { %vm4374_vm2 = vmmov %vm4368_vm3 }
 0x571   : > { %vm4376_vm6 = vmmov %vm4374_vm2 }
 0x572   : > { %vm4378_vm12 = vmmov %vm4374_vm2 }
 0x573   : > { %vm4380_vm8 = vmmov %vm4374_vm2 }
 0x574   : > { %vm4382_vm14 = vmmov %vm4374_vm2 }
 0x628   : > { %v2678_v7 = vpop.f32.mrf.mxu1 }
 0x629   : > { %1301 = vrot.lane.b32.xlu1 %v2678_v7, %s3025_s8 }
 0x62a   : > { %v1288_v36 = vpop.f32.mrf.mxu1 }
 0x62b   : > { %1299 = vrot.lane.b32.xlu0 %v1288_v36, %s3025_s8 }
 0x62d   : > { %1461 = vrot.lane.b32.xlu1 %v2678_v7, %s3024_s17 }
 0x62f   : > { %1459 = vrot.lane.b32.xlu0 %v1288_v36, %s3024_s17 }
 0x69b   : > { %v1302_v61 = vpop.permute.xlu1 %1301 }
 0x69d   : > { %v1300_v15 = vpop.permute.xlu0 %1299 }
 0x69e   : > { %2681 = vmatprep.mubr.msk.f32.mxu0 %vm556_vm5, %v1300_v15 }
 0x69f   : > { %2682 = vmatmul.mubr.msk.f32.vlgmr.msra.gmra.mxu0 %vm556_vm5, %v1302_v61  ;;  %v1462_v55 = vpop.permute.xlu1 %1461 }
 0x6a0   : > { %2688 = vmatprep.mubr.msk.f32.mxu0 %vm4365_vm7, %v4364_v40 }
 0x6a1   : > { %v1460_v17 = vpop.permute.xlu0 %1459 }
 0x6a2   : > { %2693 = vmatprep.mubr.msk.f32.mxu1 %vm556_vm5, %v1460_v17 }
 0x6a3   : > { %2694 = vmatmul.mubr.msk.f32.vlgmr.msra.gmra.mxu1 %vm556_vm5, %v1462_v55 }
 0x75f   : > { %v2683_v9 = vpop.f32.mrf.mxu0 }
 0x760   : > { %v1383_v43 = vmul.f32 %v2683_v9, %v3268_v27  ;;  %v4373_v27 = vld [vmem:[#allocation12_spill] sm:$0xff] }
 0x761   : > { %v1373_v1 = vpop.f32.mrf.mxu0 }
 0x762   : > { %v1382_v12 = vmul.f32 %v1373_v1, %v3277_v31  ;;  %2684 = vmatprep.subr.mxu0 %v1383_v43  ;;  %v4375_v31 = vld [vmem:[#allocation13_spill] sm:$0xff] }
 0x763   : > { %2685 = vmatpush3.msra.mxu0 %v1383_v43 }
 0x764   : > { %2686 = vmatprep.subr.mxu0 %v1382_v12 }
 0x765   : > { %2687 = vmatpush3.msra.mxu0 %v1382_v12 }
 0x766   : > { %2689 = vmatmul.mubr.msk.f32.vlgmr.msra.gmra.mxu0 %vm4366_vm4, %v4364_v40  ;;  %2696 = vmatprep.subr.mxu0 %v2678_v7 }
 0x767   : > { %2697 = vmatpush3.msra.mxu0 %v2678_v7  ;;  %2700 = vmatprep.mubr.msk.f32.mxu0 %vm4367_vm9, %v3291_v39  ;;  %v4377_v39 = vld [vmem:[#allocation14_spill] sm:$0xff] }
 0x768   : > { %2698 = vmatprep.subr.mxu0 %v1288_v36 }
 0x769   : > { %2699 = vmatpush3.msra.mxu0 %v1288_v36 }
 0x76a   : > { %2701 = vmatmul.mubr.msk.f32.vlgmr.msra.gmra.mxu0 %vm4368_vm3, %v3308_v44  ;;  %2759 = vmatprep.subr.msk.mxu0 %vm267_vm1, %v4364_v40  ;;  %v4381_v44 = vld [vmem:[#allocation16_spill] sm:$0xff] }
 0x76b   : > { %2703 = vmatprep.mubr.msk.f32.mxu0 %vm4369_vm10, %v3311_v45  ;;  %2760 = vmatpush3.msk.msra.mxu0 %vm267_vm1, %v4364_v40  ;;  %v4383_v45 = vld [vmem:[#allocation17_spill] sm:$0xff]  ;;  %vm4384_vm1 = vmmov %vm4374_vm2  ;;  %v2695_v40 = vpop.f32.mrf.mxu1 }
 0x76c   : > { %vm4386_vm7 = vmmov %vm4384_vm1 }
 0x76d   : > { %vm4388_vm4 = vmmov %vm4384_vm1  ;;  %v1533_v4 = vpop.f32.mrf.mxu1 }
 0x76e   : > { %2704 = vmatmul.mubr.msk.f32.gmra.mxu0 %vm4370_vm11, %v3328_v50  ;;  %v4385_v50 = vld [vmem:[#allocation18_spill] sm:$0xff]  ;;  %vm4390_vm9 = vmmov %vm4384_vm1 }
 0x76f   : > { %2706 = vmatprep.mubr.msk.f32.mxu0 %vm4371_vm13, %v3331_v51  ;;  %v4387_v51 = vld [vmem:[#allocation19_spill] sm:$0xff]  ;;  %vm4392_vm3 = vmmov %vm4384_vm1 }
 0x770   : > { %vm4397_vm10 = vmmov %vm4384_vm1 }
 0x771   : > { %vm4398_vm11 = vmmov %vm4384_vm1 }
 0x772   : > { %2707 = vmatmul.mubr.msk.f32.gmra.mxu0 %vm4372_vm15, %v3348_v56  ;;  %v4389_v56 = vld [vmem:[#allocation20_spill] sm:$0xff]  ;;  %vm4399_vm13 = vmmov %vm4384_vm1 }
 0x773   : > { %2709 = vmatprep.mubr.msk.f32.mxu0 %vm4374_vm2, %v4373_v27 }
 0x776   : > { %2710 = vmatmul.mubr.msk.f32.gmra.mxu0 %vm4376_vm6, %v4375_v31 }
 0x777   : > { %2712 = vmatprep.mubr.msk.f32.mxu0 %vm4378_vm12, %v4377_v39 }
 0x77a   : > { %2713 = vmatmul.mubr.msk.f32.gmra.mxu0 %vm4380_vm8, %v4379_v8 }
 0x77b   : > { %2715 = vmatprep.mubr.msk.f32.mxu0 %vm4382_vm14, %v4381_v44 }
 0x77e   : > { %2716 = vmatmul.mubr.msk.f32.gmra.mxu0 %vm4384_vm1, %v4383_v45  ;;  %v4394_v45 = vld [vmem:[#allocation22_spill] sm:$0xff] }
 0x77f   : > { %2718 = vmatprep.mubr.msk.f32.mxu0 %vm4386_vm7, %v4385_v50 }
 0x782   : > { %2719 = vmatmul.mubr.msk.f32.gmra.mxu0 %vm4388_vm4, %v4387_v51 }
 0x783   : > { %2721 = vmatprep.mubr.msk.f32.mxu0 %vm4390_vm9, %v4389_v56 }
 0x786   : > { %2722 = vmatmul.mubr.msk.f32.gmra.mxu0 %vm4392_vm3, %v4391_v32 }
 0x826   : > { %v2690_v0 = vpop.f32.mrf.mxu0 }
 0x827   : > { %v1539_v56 = vadd.f32 %v2695_v40, %v2690_v0 }
 0x828   : > { %v1450_v3 = vpop.f32.mrf.mxu0 }
 0x829   : > { %v1534_v34 = vadd.f32 %v1533_v4, %v1450_v3 }
 0x82a   : > { %v4097_v49 = vpop.f32.mrf.mxu0 }
 0x82b   : > { %v1542_v20 = vmul.f32 0.2, %v1534_v34 }
 0x82c   : > { %v4099_v62 = vpop.f32.mrf.mxu0 }
 0x82d   : > { %v1544_v10 = vmax.f32 %v1534_v34, %v1542_v20 }
 0x82e   : > { %v4101_v13 = vpop.f32.mrf.mxu0 }
 0x82f   : > { %v1546_v7 = vadd.f32 %v1544_v10, %v4393_v57  ;;  %v1543_v10 = vmul.f32 0.2, %v1539_v56 }
 0x830   : > { %v4104_v36 = vpop.f32.mrf.mxu0 }
 0x831   : > { %v1548_v61 = vmul.f32 1.442695, %v1546_v7  ;;  %v4395_v7 = vld [vmem:[#allocation23_spill] sm:$0xff] }
 0x832   : > { %v2708_v15 = vpop.f32.mrf.mxu0 }
 0x833   : > { %2878 = vpow2.f32 %v1548_v61 }
 0x834   : > { %v1638_v17 = vpop.f32.mrf.mxu0 }
 0x836   : > { %v2711_v55 = vpop.f32.mrf.mxu0 }
 0x838   : > { %v1648_v9 = vpop.f32.mrf.mxu0 }
 0x83a   : > { %v2714_v43 = vpop.f32.mrf.mxu0 }
 0x83c   : > { %v1658_v1 = vpop.f32.mrf.mxu0 }
 0x83e   : > { %v2717_v12 = vpop.f32.mrf.mxu0 }
 0x83f   : > { %v1708_v57 = vmul.f32 %v2717_v12, %v3604_v22 }
 0x840   : > { %v2879_v27 = vpop.eup %2878  ;;  %v1668_v31 = vpop.f32.mrf.mxu0 }
 0x841   : > { %2756 = vmatprep.mubr.f32.mxu1 %v2879_v27  ;;  %v1707_v40 = vmul.f32 %v1668_v31, %v3649_v35  ;;  %v1704_v35 = vmul.f32 %v2711_v55, %v3765_v16 }
 0x842   : > { %v2720_v39 = vpop.f32.mrf.mxu0 }
 0x843   : > { %v1710_v32 = vmul.f32 %v2720_v39, %v3527_v23  ;;  %v1723_v22 = vadd.f32 %v1707_v40, %v3735_v29  ;;  %v1720_v29 = vadd.f32 %v1704_v35, %v3856_v26  ;;  %v1698_v26 = vmul.f32 %v4097_v49, %v3964_v41  ;;  %v2890_v49 = vld [vmem:[%s3169_s24 + $0x8] sm:$0xff] }
 0x844   : > { %v1678_v8 = vpop.f32.mrf.mxu0  ;;  %v189_v35 = vld [vmem:[#allocation5 + $0x48] sm:$0xff] }
 0x845   : > { %v1709_v34 = vmul.f32 %v1678_v8, %v3573_v19  ;;  %v1726_v61 = vadd.f32 %v1710_v32, %v4395_v7  ;;  %v1724_v19 = vadd.f32 %v1708_v57, %v3694_v63 }
 0x846   : > { %v2723_v44 = vpop.f32.mrf.mxu0 }
 0x847   : > { %v1712_v50 = vmul.f32 %v2723_v44, %v4394_v45  ;;  %v1725_v23 = vadd.f32 %v1709_v34, %v3654_v37  ;;  %v186_v34 = vld [vmem:[#allocation5 + $0x38] sm:$0xff] }
 0x848   : > { %v1688_v51 = vpop.f32.mrf.mxu0 }
 0x849   : > { %v1728_v4 = vadd.f32 %v1712_v50, %v3535_v21  ;;  %v1711_v3 = vmul.f32 %v1688_v51, %v3538_v18  ;;  %v1545_v18 = vmax.f32 %v1539_v56, %v1543_v10  ;;  %v1706_v21 = vmul.f32 %v2714_v43, %v3684_v48  ;;  %v184_v10 = vld [vmem:[#allocation5 + $0x18] sm:$0xff] }
 0x84a   : > { %v1703_v48 = vmul.f32 %v1648_v9, %v3811_v33 }
 0x84b   : > { %v1727_v20 = vadd.f32 %v1711_v3, %v3578_v5  ;;  %2724 = vmatprep.subr.mxu1 %v1728_v4  ;;  %v1705_v5 = vmul.f32 %v1658_v1, %v3730_v54  ;;  %v1547_v0 = vadd.f32 %v3261_v24, %v1545_v18  ;;  %v1722_v37 = vadd.f32 %v1706_v21, %v3775_v30 }
 0x84c   : > { %2725 = vmatpush3.msra.mxu1 %v1728_v4  ;;  %v1702_v54 = vmul.f32 %v2708_v15, %v3846_v2  ;;  %v1701_v24 = vmul.f32 %v1638_v17, %v3890_v6  ;;  %v1719_v16 = vadd.f32 %v1703_v48, %v3895_v53  ;;  %v1700_v30 = vmul.f32 %v4101_v13, %v3920_v58 }
 0x84d   : > { %2726 = vmatprep.subr.mxu1 %v1727_v20  ;;  %v1721_v63 = vadd.f32 %v1705_v5, %v3816_v59  ;;  %v1550_v43 = vmul.f32 1.442695, %v1547_v0  ;;  %v1699_v59 = vmul.f32 %v4104_v36, %v3951_v47  ;;  %v1697_v53 = vmul.f32 %v4099_v62, %v3980_v11  ;;  %v2886_v11 = vld [vmem:[#allocation5 + $0x20] sm:$0xff] }
 0x84e   : > { %2727 = vmatpush3.msra.mxu1 %v1727_v20  ;;  %v1718_v33 = vadd.f32 %v1702_v54, %v3926_v14  ;;  %v1717_v2 = vadd.f32 %v1701_v24, %v3954_v60  ;;  %v1716_v6 = vadd.f32 %v1700_v30, %v3970_v25  ;;  %v1714_v14 = vadd.f32 %v1698_v26, %v3991_v28  ;;  %v2888_v28 = vld [vmem:[#allocation5 + $0x10] sm:$0xff]  ;;  %v185_v20 = vld [vmem:[#allocation5 + $0x28] sm:$0xff] }
 0x84f   : > { %2728 = vmatprep.subr.mxu1 %v1726_v61  ;;  %2880 = vpow2.f32 %v1550_v43  ;;  %v1715_v58 = vadd.f32 %v1699_v59, %v3983_v38  ;;  %v1713_v47 = vadd.f32 %v1697_v53, %v3997_v42  ;;  %v2887_v38 = vld [vmem:[#allocation5 + $0x30] sm:$0xff]  ;;  %v2889_v42 = vld [vmem:[#allocation5] sm:$0xff] }
 0x850   : > { %2729 = vmatpush3.msra.mxu1 %v1726_v61  ;;  %v2891_v62 = vld [vmem:[%s3169_s24] sm:$0xff] }
 0x851   : > { %2730 = vmatprep.subr.mxu1 %v1725_v23 }
 0x852   : > { %2731 = vmatpush3.msra.mxu1 %v1725_v23 }
 0x853   : > { %2732 = vmatprep.subr.mxu1 %v1724_v19 }
 0x854   : > { %2733 = vmatpush3.msra.mxu1 %v1724_v19 }
 0x855   : > { %2734 = vmatprep.subr.mxu1 %v1723_v22 }
 0x856   : > { %2735 = vmatpush3.msra.mxu1 %v1723_v22  ;;  %v190_v22 = vld [vmem:[#allocation5 + $0x58] sm:$0xff] }
 0x857   : > { %2736 = vmatprep.subr.mxu1 %v1722_v37 }
 0x858   : > { %2737 = vmatpush3.msra.mxu1 %v1722_v37 }
 0x859   : > { %2738 = vmatprep.subr.mxu1 %v1721_v63 }
 0x85a   : > { %2739 = vmatpush3.msra.mxu1 %v1721_v63 }
 0x85b   : > { %2740 = vmatprep.subr.mxu1 %v1720_v29 }
 0x85c   : > { %2741 = vmatpush3.msra.mxu1 %v1720_v29  ;;  %v2881_v60 = vpop.eup %2880 }
 0x85d   : > { %2742 = vmatprep.subr.mxu1 %v1719_v16 }
 0x85e   : > { %2743 = vmatpush3.msra.mxu1 %v1719_v16 }
 0x85f   : > { %2744 = vmatprep.subr.mxu1 %v1718_v33 }
 0x860   : > { %2745 = vmatpush3.msra.mxu1 %v1718_v33 }
 0x861   : > { %2746 = vmatprep.subr.mxu1 %v1717_v2 }
 0x862   : > { %2747 = vmatpush3.msra.mxu1 %v1717_v2 }
 0x863   : > { %2748 = vmatprep.subr.mxu1 %v1716_v6 }
 0x864   : > { %2749 = vmatpush3.msra.mxu1 %v1716_v6 }
 0x865   : > { %2750 = vmatprep.subr.mxu1 %v1715_v58 }
 0x866   : > { %2751 = vmatpush3.msra.mxu1 %v1715_v58 }
 0x867   : > { %2752 = vmatprep.subr.mxu1 %v1714_v14 }
 0x868   : > { %2753 = vmatpush3.msra.mxu1 %v1714_v14 }
 0x869   : > { %2754 = vmatprep.subr.mxu1 %v1713_v47 }
 0x86a   : > { %2755 = vmatpush3.msra.mxu1 %v1713_v47 }
 0x86b   : > { %2757 = vmatmul.mubr.f32.vlgmr.msra.gmra.mxu1 %v2881_v60 }
 0x92b   : > { %v2758_v41 = vpop.f32.mrf.mxu1 }
 0x92c   : > { %1808 = vrot.lane.b32.xlu1 %v2758_v41, %s3024_s17 }
 0x92d   : > { %v1795_v25 = vpop.f32.mrf.mxu1 }
 0x92e   : > { %1806 = vrot.lane.b32.xlu0 %v1795_v25, %s3024_s17 }
 0x930   : > { %1907 = vrot.lane.b32.xlu1 %v2886_v11, %s3027_s18 }
 0x932   : > { %1909 = vrot.lane.b32.xlu0 %v2887_v38, %s3027_s18 }
 0x934   : > { %1895 = vrot.lane.b32.xlu1 %v4032_v46, %s3024_s17 }
 0x936   : > { %1905 = vrot.lane.b32.xlu0 %v2888_v28, %s3027_s18 }
 0x938   : > { %1903 = vrot.lane.b32.xlu1 %v2889_v42, %s3027_s18 }
 0x93a   : > { %1897 = vrot.lane.b32.xlu0 %v4034_v52, %s3024_s17 }
 0x93c   : > { %1998 = vrot.lane.b32.xlu1 %v2890_v49, %s3024_s17 }
 0x93e   : > { %1996 = vrot.lane.b32.xlu0 %v2891_v62, %s3024_s17 }
 0x940   : > { %2002 = vrot.lane.b32.xlu1 %v4034_v52, %s3028_s19  ;;  %v183_v52 = vld [vmem:[#allocation5 + $0x8] sm:$0xff] }
 0x942   : > { %2000 = vrot.lane.b32.xlu0 %v4032_v46, %s3028_s19 }
 0x99e   : > { %v1809_v36 = vpop.permute.xlu1 %1808 }
 0x9a0   : > { %v1807_v13 = vpop.permute.xlu0 %1806 }
 0x9a1   : > { %2761 = vmatprep.mubr.msk.f32.mxu0 %vm556_vm5, %v1807_v13 }
 0x9a2   : > { %2762 = vmatmul.mubr.msk.f32.vlgmr.msra.gmra.mxu0 %vm556_vm5, %v1809_v36  ;;  %v1908_v17 = vpop.permute.xlu1 %1907  ;;  %vm4396_vm5 = vmmov %vm4384_vm1 }
 0x9a4   : > { %v1910_v15 = vpop.permute.xlu0 %1909 }
 0x9a5   : > { %2764 = vmatprep.subr.mxu1 %v1910_v15 }
 0x9a6   : > { %2765 = vmatpush3.msra.mxu1 %v1910_v15  ;;  %v1896_v9 = vpop.permute.xlu1 %1895 }
 0x9a7   : > { %2766 = vmatprep.subr.mxu1 %v1908_v17 }
 0x9a8   : > { %2767 = vmatpush3.msra.mxu1 %v1908_v17  ;;  %v1906_v55 = vpop.permute.xlu0 %1905 }
 0x9a9   : > { %2768 = vmatprep.subr.mxu1 %v1906_v55 }
 0x9aa   : > { %2769 = vmatpush3.msra.mxu1 %v1906_v55  ;;  %v1904_v1 = vpop.permute.xlu1 %1903 }
 0x9ab   : > { %2770 = vmatprep.subr.mxu1 %v1904_v1 }
 0x9ac   : > { %2771 = vmatpush3.msra.mxu1 %v1904_v1  ;;  %v1898_v45 = vpop.permute.xlu0 %1897 }
 0x9ae   : > { %v1999_v3 = vpop.permute.xlu1 %1998 }
 0x9b0   : > { %v1997_v56 = vpop.permute.xlu0 %1996 }
 0x9b1   : > { %2779 = vmatprep.mubr.msk.f32.mxu0 %vm4396_vm5, %v1997_v56 }
 0x9b2   : > { %v2003_v46 = vpop.permute.xlu1 %2002 }
 0x9b4   : > { %v2001_v7 = vpop.permute.xlu0 %2000 }
 0xa62   : > { %v2763_v12 = vpop.f32.mrf.mxu0 }
 0xa63   : > { %2882 = vrcp.f32 %v2763_v12 }
 0xa64   : > { %v1880_v27 = vpop.f32.mrf.mxu0 }
 0xa65   : > { %2884 = vrcp.f32 %v1880_v27 }
 0xa70   : > { %v2883_v31 = vpop.eup %2882 }
 0xa71   : > { %v1892_v8 = vmul.f32 %v2883_v31, %v2758_v41 }
 0xa72   : > { %v2885_v39 = vpop.eup %2884 }
 0xa73   : > { %v1890_v44 = vmul.f32 %v2885_v39, %v1795_v25  ;;  %v1902_v51 = vadd.f32 %v1898_v45, %v1892_v8 }
 0xa75   : > { %v1901_v50 = vadd.f32 %v1896_v9, %v1890_v44 }
 0xa77   : > { %2772 = vmatprep.mubr.msk.f32.mxu1 %vm470_vm0, %v1901_v50 }
 0xa78   : > { %2773 = vmatmul.mubr.msk.f32.vlgmr.msra.gmra.mxu1 %vm470_vm0, %v1902_v51 }
 0xa79   : > { %2797 = vmatprep.mubr.msk.f32.mxu1 %vm4397_vm10, %v1997_v56 }
 0xb38   : > { %v2774_v32 = vpop.f32.mrf.mxu1 }
 0xb39   : > { %2775 = vmatprep.subr.mxu0 %v2774_v32 }
 0xb3a   : > { %v1987_v4 = vpop.f32.mrf.mxu1  ;;  %2776 = vmatpush3.msra.mxu0 %v2774_v32 }
 0xb3b   : > { %2777 = vmatprep.subr.mxu0 %v1987_v4 }
 0xb3c   : > { %2778 = vmatpush3.msra.mxu0 %v1987_v4 }
 0xb3d   : > { %2780 = vmatmul.mubr.msk.f32.vlgmr.msra.gmra.mxu0 %vm4398_vm11, %v1999_v3  ;;  %2782 = vmatprep.subr.mxu0 %v186_v34 }
 0xb3e   : > { %2783 = vmatpush3.msra.mxu0 %v186_v34 }
 0xb3f   : > { %2784 = vmatprep.subr.mxu0 %v185_v20 }
 0xb40   : > { %2785 = vmatpush3.msra.mxu0 %v185_v20 }
 0xb41   : > { %2786 = vmatprep.subr.mxu0 %v184_v10 }
 0xb42   : > { %2787 = vmatpush3.msra.mxu0 %v184_v10 }
 0xb43   : > { %2788 = vmatprep.subr.mxu0 %v183_v52 }
 0xb44   : > { %2789 = vmatpush3.msra.mxu0 %v183_v52 }
 0xbfd   : > { %v2781_v57 = vpop.f32.mrf.mxu0 }
 0xbfe   : > { %v2082_v61 = vadd.f32 %v2781_v57, %v2003_v46 }
 0xbff   : > { %v2076_v40 = vpop.f32.mrf.mxu0 }
 0xc00   : > { %v2077_v23 = vadd.f32 %v2076_v40, %v2001_v7  ;;  %v2086_v21 = vmax.f32 %v2082_v61, 0.0 }
 0xc02   : > { %v2085_v18 = vmax.f32 %v2077_v23, 0.0 }
 0xc04   : > { %2790 = vmatprep.mubr.msk.f32.mxu0 %vm470_vm0, %v2085_v18 }
 0xc05   : > { %2791 = vmatmul.mubr.msk.f32.vlgmr.msra.gmra.mxu0 %vm470_vm0, %v2086_v21 }
 0xcc5   : > { %v2792_v19 = vpop.f32.mrf.mxu0 }
 0xcc6   : > { %2793 = vmatprep.subr.mxu1 %v2792_v19 }
 0xcc7   : > { %v2159_v5 = vpop.f32.mrf.mxu0  ;;  %2794 = vmatpush3.msra.mxu1 %v2792_v19 }
 0xcc8   : > { %2795 = vmatprep.subr.mxu1 %v2159_v5 }
 0xcc9   : > { %2796 = vmatpush3.msra.mxu1 %v2159_v5 }
 0xcca   : > { %2798 = vmatmul.mubr.msk.f32.vlgmr.msra.gmra.mxu1 %vm4399_vm13, %v1999_v3 }
 0xd8a   : > { %v2799_v0 = vpop.f32.mrf.mxu1 }
 0xd8b   : > { %v2240_v37 = vadd.f32 %v2799_v0, %v190_v22 }
 0xd8c   : > { %v2234_v48 = vpop.f32.mrf.mxu1 }
 0xd8d   : > { %2244 = vst [vmem:[%s176_s20 + $0x8] sm:$0xff] %v2240_v37  ;;  %v2235_v63 = vadd.f32 %v2234_v48, %v189_v35 }
 0xd8f   : > { %2243 = vst [vmem:[%s176_s20] sm:$0xff] %v2235_v63 }
 0xd90   : > { %2959 = shalt.err (!%p2956_p0)
}
 0xd91   : > { %s2960_s22 = scalar_lea.hbm %s4173_s3, 256  ;;  %s2964_s15 = scalar_lea.hbm %s4218_s2, 512 }
 0xd92   : > { %p2961_p5 = scmp.ne.s32.totalorder %s4173_s3, %s2960_s22  ;;  %p2965_p4 = scmp.lt.s32.totalorder %s4173_s3, %s4218_s2 }
 0xd93   : > { %p2966_p6 = scmp.lt.s32.totalorder %s2964_s15, %s2960_s22 }
 0xd94   : > { %p2962_p9 = pnand %p2961_p5, %p4400_p11 }
 0xd95   : > { %p2967_p8 = por %p2966_p6, %p2965_p4 }
 0xd96   : > { %p2963_p1 = pneg %p2962_p9 }
 0xd98   : > { %p2968_p3 = pnand %p2967_p8, %p2963_p1 }
 0xd9a   : > { %2971 = shalt.err (!%p2968_p3)
}
 0xd9b   : > { %s3030_s18 = smov 128   ;;  %s3031_s19 = smov 8  }
 0xd9c   : > { %2806 = dma.vmem_to_hbm [thread:$0]  (%p4400_p11), %s4168_s25, 256, %s4173_s3, %s2246_s4, %s3030_s18, %s3030_s18, %s3031_s19  }
 0xd9d PF: > { %s2274_s20 = sand.u32 1, %s3002_s9   ;;  %p4401_p7 = scmp.ne.s32.totalorder %s4242_s16, 0 }
 0xd9e   : > { %p4402_p12 = scmp.ge.s32.totalorder %s3014_s12, 2  ;;  %s2275_s26 = scalar_lea.sflag [#allocation4], %s2274_s20 }
 0xda0   : > { %p2817_p10 = pnand %p4402_p12, %p4401_p7 }
 0xda2   : > { %p2818_p2 = pneg %p2817_p10 }
 0xda4   : > { %2997 = dma.done.wait (%p2818_p2), %s2275_s26, 256  }
 0xda5   : > { %2999 = vsyncadd (%p2818_p2), %s2275_s26, 4294967040  ;;  %p16_p13 = scmp.ge.s32.totalorder %s3101_s21, 4   ;;  %s4403_s9 = smov %s3006_s10 }
 0xda6   : > { %s4404_s10 = smov %s3010_s11  ;;  %s4405_s11 = smov %s3118_s29 }
 0xda7   : > { %s4406_s12 = smov %s3101_s21  ;;  %18 = sbr.rel (!%p16_p13) target bundleno = 6 (0x6), region = 77 }
 0xdac   :  { %2280 = vsyncpa [#allocation3], 1 }
 0xdad   :  { %2282 = vsyncpa [#allocation3 + $0x1], 1 }
 0xdae   :  { %2283 = vsyncpa [#allocation6], 1 }
 0xdaf   :  { %2284 = vsyncpa [#allocation4], 1 }
 0xdb0   :  { %2286 = vsyncpa [#allocation4 + $0x1], 1 }

</bundles_post_ra>
